<compile_context>
chip_gen: v7x
topology: tpu7x:2x2x1
jax: 0.10.0
libtpu: 0.0.40
codegen_flags: <defaults>
</compile_context>

<pallas_src>
import functools

import jax
import jax.numpy as jnp
from jax.experimental import pallas as pl
from jax.experimental.pallas import tpu as pltpu


def _round_up(v, m):
    return (v + m - 1) // m * m


def _rotl_lanes(v, k):
    """Left-rotate the lane (last) axis of a 2-D value by k lanes.

    out[:, j] = v[:, (j + k) % width].  Implemented as two static lane slices
    plus a concat (the RoPE-style pattern Mosaic lowers to cheap XLU lane
    moves), so the semantics are explicit regardless of rotate sign
    conventions.
    """
    if k == 0:
        return v
    return jnp.concatenate([v[:, k:], v[:, :k]], axis=1)


def _lstm_kernel(x_ref, h0_ref, c0_ref, wih_ref, whh_ref,        # inputs
                 y_ref, hn_ref, cn_ref,                          # outputs
                 pre_ref, h_sc, c_sc,                            # VMEM scratch
                 *, seq, hidden, packed, has_tail):
    """One (batch-block, seq-chunk) grid step.

    x_ref:   (Tc*Bb, in_dim)  bf16   chunk of the input, batch-block rows
    wih_ref: (in_dim, Gp)     bf16   packed / gate-blocked W_ih^T
    whh_ref: (Hp, Gp)         bf16   packed / gate-blocked W_hh^T
    h0/c0:   (Bb, Hp)         f32    initial state for this batch block
    y_ref:   (Tc, Bb, Hp)            outputs for this chunk
    pre_ref: (Tc*Bb, Gp)      f32    hoisted x @ W_ih^T for this chunk
    h_sc/c_sc: (Bb, Hp)       f32    recurrent state (persists across chunks)
    """
    Tc, Bb, Hp = y_ref.shape
    Gp = pre_ref.shape[-1]

    s_chunk = pl.program_id(1)
    n_chunks = pl.num_programs(1)

    # ---- init recurrent state at the first seq-chunk of this batch block ---
    @pl.when(s_chunk == 0)
    def _():
        h_sc[...] = h0_ref[...].astype(jnp.float32)
        c_sc[...] = c0_ref[...].astype(jnp.float32)

    # ---- Phase 1: hoisted input projection for the whole chunk (one MXU
    # matmul, off the serial critical path). ---------------------------------
    pre_ref[...] = jnp.dot(x_ref[...], wih_ref[...],
                           preferred_element_type=jnp.float32)

    whh = whh_ref[...]                     # bf16 weights, hoisted out of loop
    t_base = s_chunk * Tc

    # ---- Phase 2: serial recurrence over this chunk (static unroll, Tc<=16).
    for tt in range(Tc):
        def body(tt=tt):
            h_prev = h_sc[...]
            c_prev = c_sc[...]

            # gates: (Bb, Gp) = pre_gates[tt] + h_prev @ W_hh^T   (no bias)
            gates = pre_ref[tt * Bb:(tt + 1) * Bb, :] + jnp.dot(
                h_prev.astype(whh.dtype), whh,
                preferred_element_type=jnp.float32)

            if packed:
                # All four gates in one 128-lane block:
                # lanes [g*hidden, (g+1)*hidden) hold gate g, order (i,f,g,o).
                # 2 EUP passes (1 sigmoid + 1 tanh) instead of 6; XLU lane
                # rotations align f/g/o with the state lanes.
                sig = jax.nn.sigmoid(gates)
                th = jnp.tanh(gates)
                i_g = sig
                f_g = _rotl_lanes(sig, 1 * hidden)
                g_g = _rotl_lanes(th, 2 * hidden)
                o_g = _rotl_lanes(sig, 3 * hidden)
            else:
                # Gate-blocked layout: each gate is its own lane-aligned
                # Hp block; sigmoid only on i/f/o, tanh only on g.
                i_g = jax.nn.sigmoid(gates[:, 0 * Hp:1 * Hp])
                f_g = jax.nn.sigmoid(gates[:, 1 * Hp:2 * Hp])
                g_g = jnp.tanh(gates[:, 2 * Hp:3 * Hp])
                o_g = jax.nn.sigmoid(gates[:, 3 * Hp:4 * Hp])

            c_new = f_g * c_prev + i_g * g_g
            h_new = o_g * jnp.tanh(c_new)

            h_sc[...] = h_new
            c_sc[...] = c_new
            y_ref[tt] = h_new.astype(y_ref.dtype)    # lane-dense (Bb, Hp) store

        if has_tail:
            # Only the padded tail chunk can contain invalid steps.
            pl.when(t_base + tt < seq)(body)
        else:
            body()

    # ---- write final state once, at the last seq-chunk ---------------------
    @pl.when(s_chunk == n_chunks - 1)
    def _():
        hn_ref[...] = h_sc[...].astype(hn_ref.dtype)
        cn_ref[...] = c_sc[...].astype(cn_ref.dtype)


@jax.jit
def depth_forward(x, h, c, w_ih, w_hh):
    """Equivalent of Depth.forward(x, h, c) -> (y, (h_n, c_n)).

    x:    (seq, batch, in_dim)   time-major, like nn.LSTM default
    h, c: (1, batch, hidden)
    w_ih: (4*hidden, in_dim)     PyTorch weight_ih_l0
    w_hh: (4*hidden, hidden)     PyTorch weight_hh_l0
    """
    seq, batch, in_dim = x.shape
    hidden = h.shape[-1]
    dt = x.dtype

    Bp = _round_up(batch, 8)            # sublane alignment
    Hp = _round_up(hidden, 128)         # lane alignment for the h/c state
    packed = (4 * hidden) <= 128        # all gates fit in one 128-lane block
    Gp = 128 if packed else 4 * Hp      # lane width of the gates tile

    # v7x megacore: split the padded batch over two parallel grid blocks when
    # it is large enough; nb=1 (no-op) otherwise / on 1-TC chips.
    nb = 2 if (Bp >= 16 and Bp % 16 == 0) else 1
    Bb = Bp // nb

    # Sequence chunking: bounds VMEM-resident pre-gates to one chunk and
    # pipelines the x-load / y-writeback DMAs across chunks.
    Tc = min(seq, 16)
    n_chunks = pl.cdiv(seq, Tc)
    Sp = n_chunks * Tc
    has_tail = (Sp != seq)

    # --- weights: bf16, transposed, gate layout depending on `packed` -------
    if packed:
        # single 128-lane block [i | f | g | o], each gate `hidden` lanes wide
        wih_t = jnp.pad(w_ih.T, ((0, 0), (0, Gp - 4 * hidden)))
        whh_t = jnp.pad(w_hh.T, ((0, Hp - hidden), (0, Gp - 4 * hidden)))
    else:
        # gate-blocked: each gate padded to its own Hp (multiple-of-128) block
        w4 = jnp.pad(w_ih.reshape(4, hidden, in_dim),
                     ((0, 0), (0, Hp - hidden), (0, 0)))
        wih_t = jnp.transpose(w4, (2, 0, 1)).reshape(in_dim, 4 * Hp)
        u4 = jnp.pad(w_hh.reshape(4, hidden, hidden),
                     ((0, 0), (0, Hp - hidden), (0, Hp - hidden)))
        whh_t = jnp.transpose(u4, (2, 0, 1)).reshape(Hp, 4 * Hp)
    wih_t = wih_t.astype(jnp.bfloat16)
    whh_t = whh_t.astype(jnp.bfloat16)

    # --- activations / state: pad batch->Bp, hidden->Hp, seq->Sp ------------
    x_p = jnp.pad(x, ((0, Sp - seq), (0, Bp - batch), (0, 0)))
    # Layout x so each (batch-block, chunk) grid step sees a flat 2-D
    # (Tc*Bb, in_dim) tile: no in-kernel reshapes (wrapper-side plumbing only).
    x_l = x_p.reshape(Sp, nb, Bb, in_dim).transpose(1, 0, 2, 3)
    x_l = x_l.reshape(nb, Sp * Bb, in_dim).astype(jnp.bfloat16)

    h0 = jnp.pad(h[0].astype(jnp.float32), ((0, Bp - batch), (0, Hp - hidden)))
    c0 = jnp.pad(c[0].astype(jnp.float32), ((0, Bp - batch), (0, Hp - hidden)))

    kernel = functools.partial(_lstm_kernel, seq=seq, hidden=hidden,
                               packed=packed, has_tail=has_tail)

    grid_spec = pltpu.PrefetchScalarGridSpec(
        num_scalar_prefetch=0,
        grid=(nb, n_chunks),                       # (batch blocks, seq chunks)
        in_specs=[
            pl.BlockSpec((None, Tc * Bb, in_dim), lambda b, s: (b, s, 0)),  # x
            pl.BlockSpec((Bb, Hp), lambda b, s: (b, 0)),                    # h0
            pl.BlockSpec((Bb, Hp), lambda b, s: (b, 0)),                    # c0
            pl.BlockSpec((in_dim, Gp), lambda b, s: (0, 0)),                # W_ih^T
            pl.BlockSpec((Hp, Gp), lambda b, s: (0, 0)),                    # W_hh^T
        ],
        out_specs=[
            pl.BlockSpec((Tc, Bb, Hp), lambda b, s: (s, b, 0)),             # y
            pl.BlockSpec((Bb, Hp), lambda b, s: (b, 0)),                    # h_n
            pl.BlockSpec((Bb, Hp), lambda b, s: (b, 0)),                    # c_n
        ],
        scratch_shapes=[
            pltpu.VMEM((Tc * Bb, Gp), jnp.float32),   # per-chunk pre-gates
            pltpu.VMEM((Bb, Hp), jnp.float32),        # h state (persistent)
            pltpu.VMEM((Bb, Hp), jnp.float32),        # c state (persistent)
        ],
    )

    y_p, h_p, c_p = pl.pallas_call(
        kernel,
        out_shape=(
            jax.ShapeDtypeStruct((Sp, Bp, Hp), dt),   # y (padded)
            jax.ShapeDtypeStruct((Bp, Hp), dt),       # h_n (padded)
            jax.ShapeDtypeStruct((Bp, Hp), dt),       # c_n (padded)
        ),
        grid_spec=grid_spec,
        compiler_params=pltpu.CompilerParams(
            dimension_semantics=("parallel", "arbitrary")),
    )(x_l, h0, c0, wih_t, whh_t)

    # Strip padding.
    y = y_p[:seq, :batch, :hidden]
    h_n = h_p[None, :batch, :hidden]
    c_n = c_p[None, :batch, :hidden]
    return y, (h_n, c_n)


def _reference_lstm(x, h, c, w_ih, w_hh):
    """Pure-JAX reference matching torch.nn.LSTM (1 layer, no bias).

    Mirrors the kernel's numerics (bf16 weights / matmul inputs, f32
    accumulation, f32 recurrent state).  Note: this is bf16-matched to the
    kernel, so it checks the kernel against a bf16 LSTM, not a pure-f32 one.
    """
    hidden = h.shape[-1]
    f32 = jnp.float32
    wih = w_ih.astype(jnp.bfloat16).astype(f32)
    whh = w_hh.astype(jnp.bfloat16).astype(f32)
    xb = x.astype(jnp.bfloat16).astype(f32)
    h_t = h[0].astype(f32)
    c_t = c[0].astype(f32)
    ys = []
    for t in range(x.shape[0]):
        gates = (xb[t] @ wih.T
                 + h_t.astype(jnp.bfloat16).astype(f32) @ whh.T)
        i = jax.nn.sigmoid(gates[:, 0 * hidden:1 * hidden])
        f = jax.nn.sigmoid(gates[:, 1 * hidden:2 * hidden])
        g = jnp.tanh(gates[:, 2 * hidden:3 * hidden])
        o = jax.nn.sigmoid(gates[:, 3 * hidden:4 * hidden])
        c_t = f * c_t + i * g
        h_t = o * jnp.tanh(c_t)
        ys.append(h_t)
    y = jnp.stack(ys).astype(x.dtype)
    return y, (h_t[None].astype(x.dtype), c_t[None].astype(x.dtype))


if __name__ == "__main__":
    seq, batch, in_dim, hidden = 8, 4, 16, 32

    key = jax.random.PRNGKey(0)
    kx, kh, kc, kwi, kwh = jax.random.split(key, 5)

    x = jax.random.normal(kx, (seq, batch, in_dim), dtype=jnp.float32)
    h = jax.random.normal(kh, (1, batch, hidden), dtype=jnp.float32)
    c = jax.random.normal(kc, (1, batch, hidden), dtype=jnp.float32)

    # PyTorch-style uniform(-1/sqrt(hidden), 1/sqrt(hidden)) init, deterministic.
    bound = 1.0 / (hidden ** 0.5)
    w_ih = jax.random.uniform(kwi, (4 * hidden, in_dim),
                              minval=-bound, maxval=bound, dtype=jnp.float32)
    w_hh = jax.random.uniform(kwh, (4 * hidden, hidden),
                              minval=-bound, maxval=bound, dtype=jnp.float32)

    y, (h_n, c_n) = depth_forward(x, h, c, w_ih, w_hh)
    jax.block_until_ready((y, h_n, c_n))

    # Correctness check against a bf16-matched pure-JAX reference.
    y_ref, (h_ref, c_ref) = _reference_lstm(x, h, c, w_ih, w_hh)
    assert y.shape == (seq, batch, hidden)
    assert h_n.shape == (1, batch, hidden) and c_n.shape == (1, batch, hidden)
    assert jnp.allclose(y, y_ref, atol=1e-3, rtol=1e-3)
    assert jnp.allclose(h_n, h_ref, atol=1e-3, rtol=1e-3)
    assert jnp.allclose(c_n, c_ref, atol=1e-3, rtol=1e-3)

    print("KERNEL_OK")
</pallas_src>

<mosaic_0001>
module attributes {stable_mosaic.version = 11 : i64} {
  func.func @_lstm_kernel(%arg0: i32, %arg1: i32, %arg2: memref<1x64x16xbf16, #tpu.memory_space<vmem>>, %arg3: memref<8x128xf32, #tpu.memory_space<vmem>>, %arg4: memref<8x128xf32, #tpu.memory_space<vmem>>, %arg5: memref<16x128xbf16, #tpu.memory_space<vmem>>, %arg6: memref<128x128xbf16, #tpu.memory_space<vmem>>, %arg7: memref<8x8x128xf32, #tpu.memory_space<vmem>>, %arg8: memref<8x128xf32, #tpu.memory_space<vmem>>, %arg9: memref<8x128xf32, #tpu.memory_space<vmem>>, %arg10: memref<64x128xf32, #tpu.memory_space<vmem>>, %arg11: memref<8x128xf32, #tpu.memory_space<vmem>>, %arg12: memref<8x128xf32, #tpu.memory_space<vmem>>) attributes {dimension_semantics = [#tpu.dimension_semantics<parallel>, #tpu.dimension_semantics<arbitrary>], iteration_bounds = array<i64: 1, 1>, scalar_prefetch = 0 : i64, scratch_operands = 3 : i64, tpu.core_type = #tpu.core_type<tc>, window_params = [{transform_indices = @transform_0, window_bounds = array<i64: 1, 64, 16>}, {transform_indices = @transform_1, window_bounds = array<i64: 8, 128>}, {transform_indices = @transform_2, window_bounds = array<i64: 8, 128>}, {pipeline_mode = #tpu.pipeline_mode<synchronous>, transform_indices = @transform_3, window_bounds = array<i64: 16, 128>}, {pipeline_mode = #tpu.pipeline_mode<synchronous>, transform_indices = @transform_4, window_bounds = array<i64: 128, 128>}, {transform_indices = @transform_5, window_bounds = array<i64: 8, 8, 128>}, {transform_indices = @transform_6, window_bounds = array<i64: 8, 128>}, {transform_indices = @transform_7, window_bounds = array<i64: 8, 128>}]} {
    %c0_i32 = arith.constant 0 : i32
    %0 = arith.cmpi eq, %arg1, %c0_i32 : i32
    %1 = arith.extui %0 : i1 to i32
    %c0_i32_0 = arith.constant 0 : i32
    %2 = arith.cmpi ne, %1, %c0_i32_0 : i32
    scf.if %2 {
      %c0_117 = arith.constant 0 : index
      %c0_118 = arith.constant 0 : index
      %260 = vector.load %arg3[%c0_117, %c0_118] : memref<8x128xf32, #tpu.memory_space<vmem>>, vector<8x128xf32>
      %c0_119 = arith.constant 0 : index
      %c0_120 = arith.constant 0 : index
      %261 = vector.load %arg11[%c0_119, %c0_120] : memref<8x128xf32, #tpu.memory_space<vmem>>, vector<8x128xf32>
      tpu.vector_store %arg11[%c0_119, %c0_120], %260 {strides = array<i32>} : memref<8x128xf32, #tpu.memory_space<vmem>>, vector<8x128xf32>,
      %c0_121 = arith.constant 0 : index
      %c0_122 = arith.constant 0 : index
      %262 = vector.load %arg4[%c0_121, %c0_122] : memref<8x128xf32, #tpu.memory_space<vmem>>, vector<8x128xf32>
      %c0_123 = arith.constant 0 : index
      %c0_124 = arith.constant 0 : index
      %263 = vector.load %arg12[%c0_123, %c0_124] : memref<8x128xf32, #tpu.memory_space<vmem>>, vector<8x128xf32>
      tpu.vector_store %arg12[%c0_123, %c0_124], %262 {strides = array<i32>} : memref<8x128xf32, #tpu.memory_space<vmem>>, vector<8x128xf32>,
    } else {
    }
    %c0 = arith.constant 0 : index
    %c0_1 = arith.constant 0 : index
    %c0_2 = arith.constant 0 : index
    %3 = vector.load %arg2[%c0, %c0_1, %c0_2] : memref<1x64x16xbf16, #tpu.memory_space<vmem>>, vector<1x64x16xbf16>
    %4 = vector.shape_cast %3 : vector<1x64x16xbf16> to vector<64x16xbf16>
    %c0_3 = arith.constant 0 : index
    %c0_4 = arith.constant 0 : index
    %5 = vector.load %arg5[%c0_3, %c0_4] : memref<16x128xbf16, #tpu.memory_space<vmem>>, vector<16x128xbf16>
    %cst = arith.constant dense<0.000000e+00> : vector<64x128xf32>
    %6 = tpu.matmul %4, %5, %cst {dimension_numbers = #tpu.dot_dimension_numbers<[1], [0], [0], [1], [0, 0, 1, 1], [], []>} : vector<64x16xbf16>, vector<16x128xbf16>, vector<64x128xf32> -> vector<64x128xf32>
    %c0_5 = arith.constant 0 : index
    %c0_6 = arith.constant 0 : index
    %7 = vector.load %arg10[%c0_5, %c0_6] : memref<64x128xf32, #tpu.memory_space<vmem>>, vector<64x128xf32>
    tpu.vector_store %arg10[%c0_5, %c0_6], %6 {strides = array<i32>} : memref<64x128xf32, #tpu.memory_space<vmem>>, vector<64x128xf32>,
    %c0_7 = arith.constant 0 : index
    %c0_8 = arith.constant 0 : index
    %8 = vector.load %arg6[%c0_7, %c0_8] : memref<128x128xbf16, #tpu.memory_space<vmem>>, vector<128x128xbf16>
    %c0_9 = arith.constant 0 : index
    %c0_10 = arith.constant 0 : index
    %9 = vector.load %arg11[%c0_9, %c0_10] : memref<8x128xf32, #tpu.memory_space<vmem>>, vector<8x128xf32>
    %c0_11 = arith.constant 0 : index
    %c0_12 = arith.constant 0 : index
    %10 = vector.load %arg12[%c0_11, %c0_12] : memref<8x128xf32, #tpu.memory_space<vmem>>, vector<8x128xf32>
    %c0_13 = arith.constant 0 : index
    %c0_14 = arith.constant 0 : index
    %11 = vector.load %arg10[%c0_13, %c0_14] : memref<64x128xf32, #tpu.memory_space<vmem>>, vector<8x128xf32>
    %12 = arith.truncf %9 : vector<8x128xf32> to vector<8x128xbf16>
    %cst_15 = arith.constant dense<0.000000e+00> : vector<8x128xf32>
    %13 = tpu.matmul %12, %8, %cst_15 {dimension_numbers = #tpu.dot_dimension_numbers<[1], [0], [0], [1], [0, 0, 1, 1], [], []>} : vector<8x128xbf16>, vector<128x128xbf16>, vector<8x128xf32> -> vector<8x128xf32>
    %14 = arith.addf %11, %13 : vector<8x128xf32>
    %15 = arith.negf %14 : vector<8x128xf32>
    %16 = math.exp %15 : vector<8x128xf32>
    %cst_16 = arith.constant 1.000000e+00 : f32
    %17 = vector.broadcast %cst_16 : f32 to vector<8x128xf32>
    %18 = arith.addf %17, %16 : vector<8x128xf32>
    %19 = arith.divf %17, %18 : vector<8x128xf32>
    %20 = math.tanh %14 : vector<8x128xf32>
    %21 = vector.extract_strided_slice %19 {offsets = [0, 32], sizes = [8, 96], strides = [1, 1]} : vector<8x128xf32> to vector<8x96xf32>
    %22 = vector.extract_strided_slice %19 {offsets = [0, 0], sizes = [8, 32], strides = [1, 1]} : vector<8x128xf32> to vector<8x32xf32>
    %23 = tpu.concatenate %21, %22 in 1 : vector<8x96xf32>, vector<8x32xf32> -> vector<8x128xf32>
    %24 = vector.extract_strided_slice %20 {offsets = [0, 64], sizes = [8, 64], strides = [1, 1]} : vector<8x128xf32> to vector<8x64xf32>
    %25 = vector.extract_strided_slice %20 {offsets = [0, 0], sizes = [8, 64], strides = [1, 1]} : vector<8x128xf32> to vector<8x64xf32>
    %26 = tpu.concatenate %24, %25 in 1 : vector<8x64xf32>, vector<8x64xf32> -> vector<8x128xf32>
    %27 = vector.extract_strided_slice %19 {offsets = [0, 96], sizes = [8, 32], strides = [1, 1]} : vector<8x128xf32> to vector<8x32xf32>
    %28 = vector.extract_strided_slice %19 {offsets = [0, 0], sizes = [8, 96], strides = [1, 1]} : vector<8x128xf32> to vector<8x96xf32>
    %29 = tpu.concatenate %27, %28 in 1 : vector<8x32xf32>, vector<8x96xf32> -> vector<8x128xf32>
    %30 = arith.mulf %23, %10 : vector<8x128xf32>
    %31 = arith.mulf %19, %26 : vector<8x128xf32>
    %32 = arith.addf %30, %31 : vector<8x128xf32>
    %33 = math.tanh %32 : vector<8x128xf32>
    %34 = arith.mulf %29, %33 : vector<8x128xf32>
    %c0_17 = arith.constant 0 : index
    %c0_18 = arith.constant 0 : index
    %35 = vector.load %arg11[%c0_17, %c0_18] : memref<8x128xf32, #tpu.memory_space<vmem>>, vector<8x128xf32>
    tpu.vector_store %arg11[%c0_17, %c0_18], %34 {strides = array<i32>} : memref<8x128xf32, #tpu.memory_space<vmem>>, vector<8x128xf32>,
    %c0_19 = arith.constant 0 : index
    %c0_20 = arith.constant 0 : index
    %36 = vector.load %arg12[%c0_19, %c0_20] : memref<8x128xf32, #tpu.memory_space<vmem>>, vector<8x128xf32>
    tpu.vector_store %arg12[%c0_19, %c0_20], %32 {strides = array<i32>} : memref<8x128xf32, #tpu.memory_space<vmem>>, vector<8x128xf32>,
    %c0_21 = arith.constant 0 : index
    %c0_22 = arith.constant 0 : index
    %c0_23 = arith.constant 0 : index
    %37 = vector.load %arg7[%c0_21, %c0_22, %c0_23] : memref<8x8x128xf32, #tpu.memory_space<vmem>>, vector<1x8x128xf32>
    %38 = vector.shape_cast %37 : vector<1x8x128xf32> to vector<8x128xf32>
    %39 = vector.shape_cast %34 : vector<8x128xf32> to vector<1x8x128xf32>
    tpu.vector_store %arg7[%c0_21, %c0_22, %c0_23], %39 {strides = array<i32>} : memref<8x8x128xf32, #tpu.memory_space<vmem>>, vector<1x8x128xf32>,
    %c0_24 = arith.constant 0 : index
    %c0_25 = arith.constant 0 : index
    %40 = vector.load %arg11[%c0_24, %c0_25] : memref<8x128xf32, #tpu.memory_space<vmem>>, vector<8x128xf32>
    %c0_26 = arith.constant 0 : index
    %c0_27 = arith.constant 0 : index
    %41 = vector.load %arg12[%c0_26, %c0_27] : memref<8x128xf32, #tpu.memory_space<vmem>>, vector<8x128xf32>
    %c8 = arith.constant 8 : index
    %c0_28 = arith.constant 0 : index
    %42 = vector.load %arg10[%c8, %c0_28] : memref<64x128xf32, #tpu.memory_space<vmem>>, vector<8x128xf32>
    %43 = arith.truncf %40 : vector<8x128xf32> to vector<8x128xbf16>
    %cst_29 = arith.constant dense<0.000000e+00> : vector<8x128xf32>
    %44 = tpu.matmul %43, %8, %cst_29 {dimension_numbers = #tpu.dot_dimension_numbers<[1], [0], [0], [1], [0, 0, 1, 1], [], []>} : vector<8x128xbf16>, vector<128x128xbf16>, vector<8x128xf32> -> vector<8x128xf32>
    %45 = arith.addf %42, %44 : vector<8x128xf32>
    %46 = arith.negf %45 : vector<8x128xf32>
    %47 = math.exp %46 : vector<8x128xf32>
    %cst_30 = arith.constant 1.000000e+00 : f32
    %48 = vector.broadcast %cst_30 : f32 to vector<8x128xf32>
    %49 = arith.addf %48, %47 : vector<8x128xf32>
    %50 = arith.divf %48, %49 : vector<8x128xf32>
    %51 = math.tanh %45 : vector<8x128xf32>
    %52 = vector.extract_strided_slice %50 {offsets = [0, 32], sizes = [8, 96], strides = [1, 1]} : vector<8x128xf32> to vector<8x96xf32>
    %53 = vector.extract_strided_slice %50 {offsets = [0, 0], sizes = [8, 32], strides = [1, 1]} : vector<8x128xf32> to vector<8x32xf32>
    %54 = tpu.concatenate %52, %53 in 1 : vector<8x96xf32>, vector<8x32xf32> -> vector<8x128xf32>
    %55 = vector.extract_strided_slice %51 {offsets = [0, 64], sizes = [8, 64], strides = [1, 1]} : vector<8x128xf32> to vector<8x64xf32>
    %56 = vector.extract_strided_slice %51 {offsets = [0, 0], sizes = [8, 64], strides = [1, 1]} : vector<8x128xf32> to vector<8x64xf32>
    %57 = tpu.concatenate %55, %56 in 1 : vector<8x64xf32>, vector<8x64xf32> -> vector<8x128xf32>
    %58 = vector.extract_strided_slice %50 {offsets = [0, 96], sizes = [8, 32], strides = [1, 1]} : vector<8x128xf32> to vector<8x32xf32>
    %59 = vector.extract_strided_slice %50 {offsets = [0, 0], sizes = [8, 96], strides = [1, 1]} : vector<8x128xf32> to vector<8x96xf32>
    %60 = tpu.concatenate %58, %59 in 1 : vector<8x32xf32>, vector<8x96xf32> -> vector<8x128xf32>
    %61 = arith.mulf %54, %41 : vector<8x128xf32>
    %62 = arith.mulf %50, %57 : vector<8x128xf32>
    %63 = arith.addf %61, %62 : vector<8x128xf32>
    %64 = math.tanh %63 : vector<8x128xf32>
    %65 = arith.mulf %60, %64 : vector<8x128xf32>
    %c0_31 = arith.constant 0 : index
    %c0_32 = arith.constant 0 : index
    %66 = vector.load %arg11[%c0_31, %c0_32] : memref<8x128xf32, #tpu.memory_space<vmem>>, vector<8x128xf32>
    tpu.vector_store %arg11[%c0_31, %c0_32], %65 {strides = array<i32>} : memref<8x128xf32, #tpu.memory_space<vmem>>, vector<8x128xf32>,
    %c0_33 = arith.constant 0 : index
    %c0_34 = arith.constant 0 : index
    %67 = vector.load %arg12[%c0_33, %c0_34] : memref<8x128xf32, #tpu.memory_space<vmem>>, vector<8x128xf32>
    tpu.vector_store %arg12[%c0_33, %c0_34], %63 {strides = array<i32>} : memref<8x128xf32, #tpu.memory_space<vmem>>, vector<8x128xf32>,
    %c1 = arith.constant 1 : index
    %c0_35 = arith.constant 0 : index
    %c0_36 = arith.constant 0 : index
    %68 = vector.load %arg7[%c1, %c0_35, %c0_36] : memref<8x8x128xf32, #tpu.memory_space<vmem>>, vector<1x8x128xf32>
    %69 = vector.shape_cast %68 : vector<1x8x128xf32> to vector<8x128xf32>
    %70 = vector.shape_cast %65 : vector<8x128xf32> to vector<1x8x128xf32>
    tpu.vector_store %arg7[%c1, %c0_35, %c0_36], %70 {strides = array<i32>} : memref<8x8x128xf32, #tpu.memory_space<vmem>>, vector<1x8x128xf32>,
    %c0_37 = arith.constant 0 : index
    %c0_38 = arith.constant 0 : index
    %71 = vector.load %arg11[%c0_37, %c0_38] : memref<8x128xf32, #tpu.memory_space<vmem>>, vector<8x128xf32>
    %c0_39 = arith.constant 0 : index
    %c0_40 = arith.constant 0 : index
    %72 = vector.load %arg12[%c0_39, %c0_40] : memref<8x128xf32, #tpu.memory_space<vmem>>, vector<8x128xf32>
    %c16 = arith.constant 16 : index
    %c0_41 = arith.constant 0 : index
    %73 = vector.load %arg10[%c16, %c0_41] : memref<64x128xf32, #tpu.memory_space<vmem>>, vector<8x128xf32>
    %74 = arith.truncf %71 : vector<8x128xf32> to vector<8x128xbf16>
    %cst_42 = arith.constant dense<0.000000e+00> : vector<8x128xf32>
    %75 = tpu.matmul %74, %8, %cst_42 {dimension_numbers = #tpu.dot_dimension_numbers<[1], [0], [0], [1], [0, 0, 1, 1], [], []>} : vector<8x128xbf16>, vector<128x128xbf16>, vector<8x128xf32> -> vector<8x128xf32>
    %76 = arith.addf %73, %75 : vector<8x128xf32>
    %77 = arith.negf %76 : vector<8x128xf32>
    %78 = math.exp %77 : vector<8x128xf32>
    %cst_43 = arith.constant 1.000000e+00 : f32
    %79 = vector.broadcast %cst_43 : f32 to vector<8x128xf32>
    %80 = arith.addf %79, %78 : vector<8x128xf32>
    %81 = arith.divf %79, %80 : vector<8x128xf32>
    %82 = math.tanh %76 : vector<8x128xf32>
    %83 = vector.extract_strided_slice %81 {offsets = [0, 32], sizes = [8, 96], strides = [1, 1]} : vector<8x128xf32> to vector<8x96xf32>
    %84 = vector.extract_strided_slice %81 {offsets = [0, 0], sizes = [8, 32], strides = [1, 1]} : vector<8x128xf32> to vector<8x32xf32>
    %85 = tpu.concatenate %83, %84 in 1 : vector<8x96xf32>, vector<8x32xf32> -> vector<8x128xf32>
    %86 = vector.extract_strided_slice %82 {offsets = [0, 64], sizes = [8, 64], strides = [1, 1]} : vector<8x128xf32> to vector<8x64xf32>
    %87 = vector.extract_strided_slice %82 {offsets = [0, 0], sizes = [8, 64], strides = [1, 1]} : vector<8x128xf32> to vector<8x64xf32>
    %88 = tpu.concatenate %86, %87 in 1 : vector<8x64xf32>, vector<8x64xf32> -> vector<8x128xf32>
    %89 = vector.extract_strided_slice %81 {offsets = [0, 96], sizes = [8, 32], strides = [1, 1]} : vector<8x128xf32> to vector<8x32xf32>
    %90 = vector.extract_strided_slice %81 {offsets = [0, 0], sizes = [8, 96], strides = [1, 1]} : vector<8x128xf32> to vector<8x96xf32>
    %91 = tpu.concatenate %89, %90 in 1 : vector<8x32xf32>, vector<8x96xf32> -> vector<8x128xf32>
    %92 = arith.mulf %85, %72 : vector<8x128xf32>
    %93 = arith.mulf %81, %88 : vector<8x128xf32>
    %94 = arith.addf %92, %93 : vector<8x128xf32>
    %95 = math.tanh %94 : vector<8x128xf32>
    %96 = arith.mulf %91, %95 : vector<8x128xf32>
    %c0_44 = arith.constant 0 : index
    %c0_45 = arith.constant 0 : index
    %97 = vector.load %arg11[%c0_44, %c0_45] : memref<8x128xf32, #tpu.memory_space<vmem>>, vector<8x128xf32>
    tpu.vector_store %arg11[%c0_44, %c0_45], %96 {strides = array<i32>} : memref<8x128xf32, #tpu.memory_space<vmem>>, vector<8x128xf32>,
    %c0_46 = arith.constant 0 : index
    %c0_47 = arith.constant 0 : index
    %98 = vector.load %arg12[%c0_46, %c0_47] : memref<8x128xf32, #tpu.memory_space<vmem>>, vector<8x128xf32>
    tpu.vector_store %arg12[%c0_46, %c0_47], %94 {strides = array<i32>} : memref<8x128xf32, #tpu.memory_space<vmem>>, vector<8x128xf32>,
    %c2 = arith.constant 2 : index
    %c0_48 = arith.constant 0 : index
    %c0_49 = arith.constant 0 : index
    %99 = vector.load %arg7[%c2, %c0_48, %c0_49] : memref<8x8x128xf32, #tpu.memory_space<vmem>>, vector<1x8x128xf32>
    %100 = vector.shape_cast %99 : vector<1x8x128xf32> to vector<8x128xf32>
    %101 = vector.shape_cast %96 : vector<8x128xf32> to vector<1x8x128xf32>
    tpu.vector_store %arg7[%c2, %c0_48, %c0_49], %101 {strides = array<i32>} : memref<8x8x128xf32, #tpu.memory_space<vmem>>, vector<1x8x128xf32>,
    %c0_50 = arith.constant 0 : index
    %c0_51 = arith.constant 0 : index
    %102 = vector.load %arg11[%c0_50, %c0_51] : memref<8x128xf32, #tpu.memory_space<vmem>>, vector<8x128xf32>
    %c0_52 = arith.constant 0 : index
    %c0_53 = arith.constant 0 : index
    %103 = vector.load %arg12[%c0_52, %c0_53] : memref<8x128xf32, #tpu.memory_space<vmem>>, vector<8x128xf32>
    %c24 = arith.constant 24 : index
    %c0_54 = arith.constant 0 : index
    %104 = vector.load %arg10[%c24, %c0_54] : memref<64x128xf32, #tpu.memory_space<vmem>>, vector<8x128xf32>
    %105 = arith.truncf %102 : vector<8x128xf32> to vector<8x128xbf16>
    %cst_55 = arith.constant dense<0.000000e+00> : vector<8x128xf32>
    %106 = tpu.matmul %105, %8, %cst_55 {dimension_numbers = #tpu.dot_dimension_numbers<[1], [0], [0], [1], [0, 0, 1, 1], [], []>} : vector<8x128xbf16>, vector<128x128xbf16>, vector<8x128xf32> -> vector<8x128xf32>
    %107 = arith.addf %104, %106 : vector<8x128xf32>
    %108 = arith.negf %107 : vector<8x128xf32>
    %109 = math.exp %108 : vector<8x128xf32>
    %cst_56 = arith.constant 1.000000e+00 : f32
    %110 = vector.broadcast %cst_56 : f32 to vector<8x128xf32>
    %111 = arith.addf %110, %109 : vector<8x128xf32>
    %112 = arith.divf %110, %111 : vector<8x128xf32>
    %113 = math.tanh %107 : vector<8x128xf32>
    %114 = vector.extract_strided_slice %112 {offsets = [0, 32], sizes = [8, 96], strides = [1, 1]} : vector<8x128xf32> to vector<8x96xf32>
    %115 = vector.extract_strided_slice %112 {offsets = [0, 0], sizes = [8, 32], strides = [1, 1]} : vector<8x128xf32> to vector<8x32xf32>
    %116 = tpu.concatenate %114, %115 in 1 : vector<8x96xf32>, vector<8x32xf32> -> vector<8x128xf32>
    %117 = vector.extract_strided_slice %113 {offsets = [0, 64], sizes = [8, 64], strides = [1, 1]} : vector<8x128xf32> to vector<8x64xf32>
    %118 = vector.extract_strided_slice %113 {offsets = [0, 0], sizes = [8, 64], strides = [1, 1]} : vector<8x128xf32> to vector<8x64xf32>
    %119 = tpu.concatenate %117, %118 in 1 : vector<8x64xf32>, vector<8x64xf32> -> vector<8x128xf32>
    %120 = vector.extract_strided_slice %112 {offsets = [0, 96], sizes = [8, 32], strides = [1, 1]} : vector<8x128xf32> to vector<8x32xf32>
    %121 = vector.extract_strided_slice %112 {offsets = [0, 0], sizes = [8, 96], strides = [1, 1]} : vector<8x128xf32> to vector<8x96xf32>
    %122 = tpu.concatenate %120, %121 in 1 : vector<8x32xf32>, vector<8x96xf32> -> vector<8x128xf32>
    %123 = arith.mulf %116, %103 : vector<8x128xf32>
    %124 = arith.mulf %112, %119 : vector<8x128xf32>
    %125 = arith.addf %123, %124 : vector<8x128xf32>
    %126 = math.tanh %125 : vector<8x128xf32>
    %127 = arith.mulf %122, %126 : vector<8x128xf32>
    %c0_57 = arith.constant 0 : index
    %c0_58 = arith.constant 0 : index
    %128 = vector.load %arg11[%c0_57, %c0_58] : memref<8x128xf32, #tpu.memory_space<vmem>>, vector<8x128xf32>
    tpu.vector_store %arg11[%c0_57, %c0_58], %127 {strides = array<i32>} : memref<8x128xf32, #tpu.memory_space<vmem>>, vector<8x128xf32>,
    %c0_59 = arith.constant 0 : index
    %c0_60 = arith.constant 0 : index
    %129 = vector.load %arg12[%c0_59, %c0_60] : memref<8x128xf32, #tpu.memory_space<vmem>>, vector<8x128xf32>
    tpu.vector_store %arg12[%c0_59, %c0_60], %125 {strides = array<i32>} : memref<8x128xf32, #tpu.memory_space<vmem>>, vector<8x128xf32>,
    %c3 = arith.constant 3 : index
    %c0_61 = arith.constant 0 : index
    %c0_62 = arith.constant 0 : index
    %130 = vector.load %arg7[%c3, %c0_61, %c0_62] : memref<8x8x128xf32, #tpu.memory_space<vmem>>, vector<1x8x128xf32>
    %131 = vector.shape_cast %130 : vector<1x8x128xf32> to vector<8x128xf32>
    %132 = vector.shape_cast %127 : vector<8x128xf32> to vector<1x8x128xf32>
    tpu.vector_store %arg7[%c3, %c0_61, %c0_62], %132 {strides = array<i32>} : memref<8x8x128xf32, #tpu.memory_space<vmem>>, vector<1x8x128xf32>,
    %c0_63 = arith.constant 0 : index
    %c0_64 = arith.constant 0 : index
    %133 = vector.load %arg11[%c0_63, %c0_64] : memref<8x128xf32, #tpu.memory_space<vmem>>, vector<8x128xf32>
    %c0_65 = arith.constant 0 : index
    %c0_66 = arith.constant 0 : index
    %134 = vector.load %arg12[%c0_65, %c0_66] : memref<8x128xf32, #tpu.memory_space<vmem>>, vector<8x128xf32>
    %c32 = arith.constant 32 : index
    %c0_67 = arith.constant 0 : index
    %135 = vector.load %arg10[%c32, %c0_67] : memref<64x128xf32, #tpu.memory_space<vmem>>, vector<8x128xf32>
    %136 = arith.truncf %133 : vector<8x128xf32> to vector<8x128xbf16>
    %cst_68 = arith.constant dense<0.000000e+00> : vector<8x128xf32>
    %137 = tpu.matmul %136, %8, %cst_68 {dimension_numbers = #tpu.dot_dimension_numbers<[1], [0], [0], [1], [0, 0, 1, 1], [], []>} : vector<8x128xbf16>, vector<128x128xbf16>, vector<8x128xf32> -> vector<8x128xf32>
    %138 = arith.addf %135, %137 : vector<8x128xf32>
    %139 = arith.negf %138 : vector<8x128xf32>
    %140 = math.exp %139 : vector<8x128xf32>
    %cst_69 = arith.constant 1.000000e+00 : f32
    %141 = vector.broadcast %cst_69 : f32 to vector<8x128xf32>
    %142 = arith.addf %141, %140 : vector<8x128xf32>
    %143 = arith.divf %141, %142 : vector<8x128xf32>
    %144 = math.tanh %138 : vector<8x128xf32>
    %145 = vector.extract_strided_slice %143 {offsets = [0, 32], sizes = [8, 96], strides = [1, 1]} : vector<8x128xf32> to vector<8x96xf32>
    %146 = vector.extract_strided_slice %143 {offsets = [0, 0], sizes = [8, 32], strides = [1, 1]} : vector<8x128xf32> to vector<8x32xf32>
    %147 = tpu.concatenate %145, %146 in 1 : vector<8x96xf32>, vector<8x32xf32> -> vector<8x128xf32>
    %148 = vector.extract_strided_slice %144 {offsets = [0, 64], sizes = [8, 64], strides = [1, 1]} : vector<8x128xf32> to vector<8x64xf32>
    %149 = vector.extract_strided_slice %144 {offsets = [0, 0], sizes = [8, 64], strides = [1, 1]} : vector<8x128xf32> to vector<8x64xf32>
    %150 = tpu.concatenate %148, %149 in 1 : vector<8x64xf32>, vector<8x64xf32> -> vector<8x128xf32>
    %151 = vector.extract_strided_slice %143 {offsets = [0, 96], sizes = [8, 32], strides = [1, 1]} : vector<8x128xf32> to vector<8x32xf32>
    %152 = vector.extract_strided_slice %143 {offsets = [0, 0], sizes = [8, 96], strides = [1, 1]} : vector<8x128xf32> to vector<8x96xf32>
    %153 = tpu.concatenate %151, %152 in 1 : vector<8x32xf32>, vector<8x96xf32> -> vector<8x128xf32>
    %154 = arith.mulf %147, %134 : vector<8x128xf32>
    %155 = arith.mulf %143, %150 : vector<8x128xf32>
    %156 = arith.addf %154, %155 : vector<8x128xf32>
    %157 = math.tanh %156 : vector<8x128xf32>
    %158 = arith.mulf %153, %157 : vector<8x128xf32>
    %c0_70 = arith.constant 0 : index
    %c0_71 = arith.constant 0 : index
    %159 = vector.load %arg11[%c0_70, %c0_71] : memref<8x128xf32, #tpu.memory_space<vmem>>, vector<8x128xf32>
    tpu.vector_store %arg11[%c0_70, %c0_71], %158 {strides = array<i32>} : memref<8x128xf32, #tpu.memory_space<vmem>>, vector<8x128xf32>,
    %c0_72 = arith.constant 0 : index
    %c0_73 = arith.constant 0 : index
    %160 = vector.load %arg12[%c0_72, %c0_73] : memref<8x128xf32, #tpu.memory_space<vmem>>, vector<8x128xf32>
    tpu.vector_store %arg12[%c0_72, %c0_73], %156 {strides = array<i32>} : memref<8x128xf32, #tpu.memory_space<vmem>>, vector<8x128xf32>,
    %c4 = arith.constant 4 : index
    %c0_74 = arith.constant 0 : index
    %c0_75 = arith.constant 0 : index
    %161 = vector.load %arg7[%c4, %c0_74, %c0_75] : memref<8x8x128xf32, #tpu.memory_space<vmem>>, vector<1x8x128xf32>
    %162 = vector.shape_cast %161 : vector<1x8x128xf32> to vector<8x128xf32>
    %163 = vector.shape_cast %158 : vector<8x128xf32> to vector<1x8x128xf32>
    tpu.vector_store %arg7[%c4, %c0_74, %c0_75], %163 {strides = array<i32>} : memref<8x8x128xf32, #tpu.memory_space<vmem>>, vector<1x8x128xf32>,
    %c0_76 = arith.constant 0 : index
    %c0_77 = arith.constant 0 : index
    %164 = vector.load %arg11[%c0_76, %c0_77] : memref<8x128xf32, #tpu.memory_space<vmem>>, vector<8x128xf32>
    %c0_78 = arith.constant 0 : index
    %c0_79 = arith.constant 0 : index
    %165 = vector.load %arg12[%c0_78, %c0_79] : memref<8x128xf32, #tpu.memory_space<vmem>>, vector<8x128xf32>
    %c40 = arith.constant 40 : index
    %c0_80 = arith.constant 0 : index
    %166 = vector.load %arg10[%c40, %c0_80] : memref<64x128xf32, #tpu.memory_space<vmem>>, vector<8x128xf32>
    %167 = arith.truncf %164 : vector<8x128xf32> to vector<8x128xbf16>
    %cst_81 = arith.constant dense<0.000000e+00> : vector<8x128xf32>
    %168 = tpu.matmul %167, %8, %cst_81 {dimension_numbers = #tpu.dot_dimension_numbers<[1], [0], [0], [1], [0, 0, 1, 1], [], []>} : vector<8x128xbf16>, vector<128x128xbf16>, vector<8x128xf32> -> vector<8x128xf32>
    %169 = arith.addf %166, %168 : vector<8x128xf32>
    %170 = arith.negf %169 : vector<8x128xf32>
    %171 = math.exp %170 : vector<8x128xf32>
    %cst_82 = arith.constant 1.000000e+00 : f32
    %172 = vector.broadcast %cst_82 : f32 to vector<8x128xf32>
    %173 = arith.addf %172, %171 : vector<8x128xf32>
    %174 = arith.divf %172, %173 : vector<8x128xf32>
    %175 = math.tanh %169 : vector<8x128xf32>
    %176 = vector.extract_strided_slice %174 {offsets = [0, 32], sizes = [8, 96], strides = [1, 1]} : vector<8x128xf32> to vector<8x96xf32>
    %177 = vector.extract_strided_slice %174 {offsets = [0, 0], sizes = [8, 32], strides = [1, 1]} : vector<8x128xf32> to vector<8x32xf32>
    %178 = tpu.concatenate %176, %177 in 1 : vector<8x96xf32>, vector<8x32xf32> -> vector<8x128xf32>
    %179 = vector.extract_strided_slice %175 {offsets = [0, 64], sizes = [8, 64], strides = [1, 1]} : vector<8x128xf32> to vector<8x64xf32>
    %180 = vector.extract_strided_slice %175 {offsets = [0, 0], sizes = [8, 64], strides = [1, 1]} : vector<8x128xf32> to vector<8x64xf32>
    %181 = tpu.concatenate %179, %180 in 1 : vector<8x64xf32>, vector<8x64xf32> -> vector<8x128xf32>
    %182 = vector.extract_strided_slice %174 {offsets = [0, 96], sizes = [8, 32], strides = [1, 1]} : vector<8x128xf32> to vector<8x32xf32>
    %183 = vector.extract_strided_slice %174 {offsets = [0, 0], sizes = [8, 96], strides = [1, 1]} : vector<8x128xf32> to vector<8x96xf32>
    %184 = tpu.concatenate %182, %183 in 1 : vector<8x32xf32>, vector<8x96xf32> -> vector<8x128xf32>
    %185 = arith.mulf %178, %165 : vector<8x128xf32>
    %186 = arith.mulf %174, %181 : vector<8x128xf32>
    %187 = arith.addf %185, %186 : vector<8x128xf32>
    %188 = math.tanh %187 : vector<8x128xf32>
    %189 = arith.mulf %184, %188 : vector<8x128xf32>
    %c0_83 = arith.constant 0 : index
    %c0_84 = arith.constant 0 : index
    %190 = vector.load %arg11[%c0_83, %c0_84] : memref<8x128xf32, #tpu.memory_space<vmem>>, vector<8x128xf32>
    tpu.vector_store %arg11[%c0_83, %c0_84], %189 {strides = array<i32>} : memref<8x128xf32, #tpu.memory_space<vmem>>, vector<8x128xf32>,
    %c0_85 = arith.constant 0 : index
    %c0_86 = arith.constant 0 : index
    %191 = vector.load %arg12[%c0_85, %c0_86] : memref<8x128xf32, #tpu.memory_space<vmem>>, vector<8x128xf32>
    tpu.vector_store %arg12[%c0_85, %c0_86], %187 {strides = array<i32>} : memref<8x128xf32, #tpu.memory_space<vmem>>, vector<8x128xf32>,
    %c5 = arith.constant 5 : index
    %c0_87 = arith.constant 0 : index
    %c0_88 = arith.constant 0 : index
    %192 = vector.load %arg7[%c5, %c0_87, %c0_88] : memref<8x8x128xf32, #tpu.memory_space<vmem>>, vector<1x8x128xf32>
    %193 = vector.shape_cast %192 : vector<1x8x128xf32> to vector<8x128xf32>
    %194 = vector.shape_cast %189 : vector<8x128xf32> to vector<1x8x128xf32>
    tpu.vector_store %arg7[%c5, %c0_87, %c0_88], %194 {strides = array<i32>} : memref<8x8x128xf32, #tpu.memory_space<vmem>>, vector<1x8x128xf32>,
    %c0_89 = arith.constant 0 : index
    %c0_90 = arith.constant 0 : index
    %195 = vector.load %arg11[%c0_89, %c0_90] : memref<8x128xf32, #tpu.memory_space<vmem>>, vector<8x128xf32>
    %c0_91 = arith.constant 0 : index
    %c0_92 = arith.constant 0 : index
    %196 = vector.load %arg12[%c0_91, %c0_92] : memref<8x128xf32, #tpu.memory_space<vmem>>, vector<8x128xf32>
    %c48 = arith.constant 48 : index
    %c0_93 = arith.constant 0 : index
    %197 = vector.load %arg10[%c48, %c0_93] : memref<64x128xf32, #tpu.memory_space<vmem>>, vector<8x128xf32>
    %198 = arith.truncf %195 : vector<8x128xf32> to vector<8x128xbf16>
    %cst_94 = arith.constant dense<0.000000e+00> : vector<8x128xf32>
    %199 = tpu.matmul %198, %8, %cst_94 {dimension_numbers = #tpu.dot_dimension_numbers<[1], [0], [0], [1], [0, 0, 1, 1], [], []>} : vector<8x128xbf16>, vector<128x128xbf16>, vector<8x128xf32> -> vector<8x128xf32>
    %200 = arith.addf %197, %199 : vector<8x128xf32>
    %201 = arith.negf %200 : vector<8x128xf32>
    %202 = math.exp %201 : vector<8x128xf32>
    %cst_95 = arith.constant 1.000000e+00 : f32
    %203 = vector.broadcast %cst_95 : f32 to vector<8x128xf32>
    %204 = arith.addf %203, %202 : vector<8x128xf32>
    %205 = arith.divf %203, %204 : vector<8x128xf32>
    %206 = math.tanh %200 : vector<8x128xf32>
    %207 = vector.extract_strided_slice %205 {offsets = [0, 32], sizes = [8, 96], strides = [1, 1]} : vector<8x128xf32> to vector<8x96xf32>
    %208 = vector.extract_strided_slice %205 {offsets = [0, 0], sizes = [8, 32], strides = [1, 1]} : vector<8x128xf32> to vector<8x32xf32>
    %209 = tpu.concatenate %207, %208 in 1 : vector<8x96xf32>, vector<8x32xf32> -> vector<8x128xf32>
    %210 = vector.extract_strided_slice %206 {offsets = [0, 64], sizes = [8, 64], strides = [1, 1]} : vector<8x128xf32> to vector<8x64xf32>
    %211 = vector.extract_strided_slice %206 {offsets = [0, 0], sizes = [8, 64], strides = [1, 1]} : vector<8x128xf32> to vector<8x64xf32>
    %212 = tpu.concatenate %210, %211 in 1 : vector<8x64xf32>, vector<8x64xf32> -> vector<8x128xf32>
    %213 = vector.extract_strided_slice %205 {offsets = [0, 96], sizes = [8, 32], strides = [1, 1]} : vector<8x128xf32> to vector<8x32xf32>
    %214 = vector.extract_strided_slice %205 {offsets = [0, 0], sizes = [8, 96], strides = [1, 1]} : vector<8x128xf32> to vector<8x96xf32>
    %215 = tpu.concatenate %213, %214 in 1 : vector<8x32xf32>, vector<8x96xf32> -> vector<8x128xf32>
    %216 = arith.mulf %209, %196 : vector<8x128xf32>
    %217 = arith.mulf %205, %212 : vector<8x128xf32>
    %218 = arith.addf %216, %217 : vector<8x128xf32>
    %219 = math.tanh %218 : vector<8x128xf32>
    %220 = arith.mulf %215, %219 : vector<8x128xf32>
    %c0_96 = arith.constant 0 : index
    %c0_97 = arith.constant 0 : index
    %221 = vector.load %arg11[%c0_96, %c0_97] : memref<8x128xf32, #tpu.memory_space<vmem>>, vector<8x128xf32>
    tpu.vector_store %arg11[%c0_96, %c0_97], %220 {strides = array<i32>} : memref<8x128xf32, #tpu.memory_space<vmem>>, vector<8x128xf32>,
    %c0_98 = arith.constant 0 : index
    %c0_99 = arith.constant 0 : index
    %222 = vector.load %arg12[%c0_98, %c0_99] : memref<8x128xf32, #tpu.memory_space<vmem>>, vector<8x128xf32>
    tpu.vector_store %arg12[%c0_98, %c0_99], %218 {strides = array<i32>} : memref<8x128xf32, #tpu.memory_space<vmem>>, vector<8x128xf32>,
    %c6 = arith.constant 6 : index
    %c0_100 = arith.constant 0 : index
    %c0_101 = arith.constant 0 : index
    %223 = vector.load %arg7[%c6, %c0_100, %c0_101] : memref<8x8x128xf32, #tpu.memory_space<vmem>>, vector<1x8x128xf32>
    %224 = vector.shape_cast %223 : vector<1x8x128xf32> to vector<8x128xf32>
    %225 = vector.shape_cast %220 : vector<8x128xf32> to vector<1x8x128xf32>
    tpu.vector_store %arg7[%c6, %c0_100, %c0_101], %225 {strides = array<i32>} : memref<8x8x128xf32, #tpu.memory_space<vmem>>, vector<1x8x128xf32>,
    %c0_102 = arith.constant 0 : index
    %c0_103 = arith.constant 0 : index
    %226 = vector.load %arg11[%c0_102, %c0_103] : memref<8x128xf32, #tpu.memory_space<vmem>>, vector<8x128xf32>
    %c0_104 = arith.constant 0 : index
    %c0_105 = arith.constant 0 : index
    %227 = vector.load %arg12[%c0_104, %c0_105] : memref<8x128xf32, #tpu.memory_space<vmem>>, vector<8x128xf32>
    %c56 = arith.constant 56 : index
    %c0_106 = arith.constant 0 : index
    %228 = vector.load %arg10[%c56, %c0_106] : memref<64x128xf32, #tpu.memory_space<vmem>>, vector<8x128xf32>
    %229 = arith.truncf %226 : vector<8x128xf32> to vector<8x128xbf16>
    %cst_107 = arith.constant dense<0.000000e+00> : vector<8x128xf32>
    %230 = tpu.matmul %229, %8, %cst_107 {dimension_numbers = #tpu.dot_dimension_numbers<[1], [0], [0], [1], [0, 0, 1, 1], [], []>} : vector<8x128xbf16>, vector<128x128xbf16>, vector<8x128xf32> -> vector<8x128xf32>
    %231 = arith.addf %228, %230 : vector<8x128xf32>
    %232 = arith.negf %231 : vector<8x128xf32>
    %233 = math.exp %232 : vector<8x128xf32>
    %cst_108 = arith.constant 1.000000e+00 : f32
    %234 = vector.broadcast %cst_108 : f32 to vector<8x128xf32>
    %235 = arith.addf %234, %233 : vector<8x128xf32>
    %236 = arith.divf %234, %235 : vector<8x128xf32>
    %237 = math.tanh %231 : vector<8x128xf32>
    %238 = vector.extract_strided_slice %236 {offsets = [0, 32], sizes = [8, 96], strides = [1, 1]} : vector<8x128xf32> to vector<8x96xf32>
    %239 = vector.extract_strided_slice %236 {offsets = [0, 0], sizes = [8, 32], strides = [1, 1]} : vector<8x128xf32> to vector<8x32xf32>
    %240 = tpu.concatenate %238, %239 in 1 : vector<8x96xf32>, vector<8x32xf32> -> vector<8x128xf32>
    %241 = vector.extract_strided_slice %237 {offsets = [0, 64], sizes = [8, 64], strides = [1, 1]} : vector<8x128xf32> to vector<8x64xf32>
    %242 = vector.extract_strided_slice %237 {offsets = [0, 0], sizes = [8, 64], strides = [1, 1]} : vector<8x128xf32> to vector<8x64xf32>
    %243 = tpu.concatenate %241, %242 in 1 : vector<8x64xf32>, vector<8x64xf32> -> vector<8x128xf32>
    %244 = vector.extract_strided_slice %236 {offsets = [0, 96], sizes = [8, 32], strides = [1, 1]} : vector<8x128xf32> to vector<8x32xf32>
    %245 = vector.extract_strided_slice %236 {offsets = [0, 0], sizes = [8, 96], strides = [1, 1]} : vector<8x128xf32> to vector<8x96xf32>
    %246 = tpu.concatenate %244, %245 in 1 : vector<8x32xf32>, vector<8x96xf32> -> vector<8x128xf32>
    %247 = arith.mulf %240, %227 : vector<8x128xf32>
    %248 = arith.mulf %236, %243 : vector<8x128xf32>
    %249 = arith.addf %247, %248 : vector<8x128xf32>
    %250 = math.tanh %249 : vector<8x128xf32>
    %251 = arith.mulf %246, %250 : vector<8x128xf32>
    %c0_109 = arith.constant 0 : index
    %c0_110 = arith.constant 0 : index
    %252 = vector.load %arg11[%c0_109, %c0_110] : memref<8x128xf32, #tpu.memory_space<vmem>>, vector<8x128xf32>
    tpu.vector_store %arg11[%c0_109, %c0_110], %251 {strides = array<i32>} : memref<8x128xf32, #tpu.memory_space<vmem>>, vector<8x128xf32>,
    %c0_111 = arith.constant 0 : index
    %c0_112 = arith.constant 0 : index
    %253 = vector.load %arg12[%c0_111, %c0_112] : memref<8x128xf32, #tpu.memory_space<vmem>>, vector<8x128xf32>
    tpu.vector_store %arg12[%c0_111, %c0_112], %249 {strides = array<i32>} : memref<8x128xf32, #tpu.memory_space<vmem>>, vector<8x128xf32>,
    %c7 = arith.constant 7 : index
    %c0_113 = arith.constant 0 : index
    %c0_114 = arith.constant 0 : index
    %254 = vector.load %arg7[%c7, %c0_113, %c0_114] : memref<8x8x128xf32, #tpu.memory_space<vmem>>, vector<1x8x128xf32>
    %255 = vector.shape_cast %254 : vector<1x8x128xf32> to vector<8x128xf32>
    %256 = vector.shape_cast %251 : vector<8x128xf32> to vector<1x8x128xf32>
    tpu.vector_store %arg7[%c7, %c0_113, %c0_114], %256 {strides = array<i32>} : memref<8x8x128xf32, #tpu.memory_space<vmem>>, vector<1x8x128xf32>,
    %c0_i32_115 = arith.constant 0 : i32
    %257 = arith.cmpi eq, %arg1, %c0_i32_115 : i32
    %258 = arith.extui %257 : i1 to i32
    %c0_i32_116 = arith.constant 0 : i32
    %259 = arith.cmpi ne, %258, %c0_i32_116 : i32
    scf.if %259 {
      %c0_117 = arith.constant 0 : index
      %c0_118 = arith.constant 0 : index
      %260 = vector.load %arg11[%c0_117, %c0_118] : memref<8x128xf32, #tpu.memory_space<vmem>>, vector<8x128xf32>
      %c0_119 = arith.constant 0 : index
      %c0_120 = arith.constant 0 : index
      %261 = vector.load %arg8[%c0_119, %c0_120] : memref<8x128xf32, #tpu.memory_space<vmem>>, vector<8x128xf32>
      tpu.vector_store %arg8[%c0_119, %c0_120], %260 {strides = array<i32>} : memref<8x128xf32, #tpu.memory_space<vmem>>, vector<8x128xf32>,
      %c0_121 = arith.constant 0 : index
      %c0_122 = arith.constant 0 : index
      %262 = vector.load %arg12[%c0_121, %c0_122] : memref<8x128xf32, #tpu.memory_space<vmem>>, vector<8x128xf32>
      %c0_123 = arith.constant 0 : index
      %c0_124 = arith.constant 0 : index
      %263 = vector.load %arg9[%c0_123, %c0_124] : memref<8x128xf32, #tpu.memory_space<vmem>>, vector<8x128xf32>
      tpu.vector_store %arg9[%c0_123, %c0_124], %262 {strides = array<i32>} : memref<8x128xf32, #tpu.memory_space<vmem>>, vector<8x128xf32>,
    } else {
    }
    return
  }
  func.func @transform_0(%arg0: i32, %arg1: i32) -> (i32, i32, i32) {
    %c0_i32 = arith.constant 0 : i32
    %c0_i32_0 = arith.constant 0 : i32
    return %arg0, %arg1, %c0_i32 : i32, i32, i32
  }
  func.func @transform_1(%arg0: i32, %arg1: i32) -> (i32, i32) {
    %c0_i32 = arith.constant 0 : i32
    %c0_i32_0 = arith.constant 0 : i32
    return %arg0, %c0_i32 : i32, i32
  }
  func.func @transform_2(%arg0: i32, %arg1: i32) -> (i32, i32) {
    %c0_i32 = arith.constant 0 : i32
    %c0_i32_0 = arith.constant 0 : i32
    return %arg0, %c0_i32 : i32, i32
  }
  func.func @transform_3(%arg0: i32, %arg1: i32) -> (i32, i32) {
    %c0_i32 = arith.constant 0 : i32
    %c0_i32_0 = arith.constant 0 : i32
    %c0_i32_1 = arith.constant 0 : i32
    return %c0_i32, %c0_i32_0 : i32, i32
  }
  func.func @transform_4(%arg0: i32, %arg1: i32) -> (i32, i32) {
    %c0_i32 = arith.constant 0 : i32
    %c0_i32_0 = arith.constant 0 : i32
    %c0_i32_1 = arith.constant 0 : i32
    return %c0_i32, %c0_i32_0 : i32, i32
  }
  func.func @transform_5(%arg0: i32, %arg1: i32) -> (i32, i32, i32) {
    %c0_i32 = arith.constant 0 : i32
    %c0_i32_0 = arith.constant 0 : i32
    return %arg1, %arg0, %c0_i32 : i32, i32, i32
  }
  func.func @transform_6(%arg0: i32, %arg1: i32) -> (i32, i32) {
    %c0_i32 = arith.constant 0 : i32
    %c0_i32_0 = arith.constant 0 : i32
    return %arg0, %c0_i32 : i32, i32
  }
  func.func @transform_7(%arg0: i32, %arg1: i32) -> (i32, i32) {
    %c0_i32 = arith.constant 0 : i32
    %c0_i32_0 = arith.constant 0 : i32
    return %arg0, %c0_i32 : i32, i32
  }
}

</mosaic_0001>

<bundles_post_ra>
// kernel: depth_forward.1
= control target key start
LH: loop header
LB: loop body
LE: loop exit
PB: predicated region body
PF: predicated region fallthrough
CT: control target
= control target key end

     0   :  { %v1173_v0 = vmov 0.0   ;;  %vm1174_vm0 = vmmov 0   ;;  %vm68_vm1 = vcmask 130048   ;;  %s1175_s26 = smov 32   ;;  %s1176_s27 = smov 96   ;;  %s1499_s4 = inlined_call_operand.vmem [shape: bf16[128,128], index: 4, kind: input, shape index: {}]   ;;  %s1500_s3 = inlined_call_operand.vmem [shape: bf16[16,128], index: 3, kind: input, shape index: {}]   ;;  %s1501_s0 = inlined_call_operand.vmem [shape: bf16[1,64,16], index: 0, kind: input, shape index: {}]   ;;  %s1502_s1 = inlined_call_operand.vmem [shape: f32[8,128], index: 1, kind: input, shape index: {}]   ;;  %s1503_s2 = inlined_call_operand.vmem [shape: f32[8,128], index: 2, kind: input, shape index: {}]   ;;  %s1504_s5 = inlined_call_operand.vmem [shape: f32[8,8,128], index: 5, kind: output, shape index: {0}]   ;;  %s1505_s7 = inlined_call_operand.vmem [shape: f32[8,128], index: 7, kind: output, shape index: {2}]   ;;  %s1506_s6 = inlined_call_operand.vmem [shape: f32[8,128], index: 6, kind: output, shape index: {1}]  }
   0x1   :  { %931 = vmatprep.subr.bf16.mxu1 %v1173_v0  ;;  %v1222_v1 = vld [vmem:[%s1499_s4] sm:$0xff]   ;;  %947 = vmatprep.mubr.msk.bf16.mxu1 %vm1174_vm0, %v1173_v0  ;;  %v1230_v2 = vld [vmem:[%s1499_s4 + $0x8] sm:$0xff]   ;;  %v1236_v3 = vld [vmem:[%s1499_s4 + $0x10] sm:$0xff]   ;;  %s1177_s28 = smov 64  }
   0x2   :  { %932 = vmatpush3.bf16.msra.mxu1 %v1222_v1  ;;  %v1102_v4 = vld [vmem:[%s1500_s3] sm:$0xff]   ;;  %v1105_v6 = vld [vmem:[%s1501_s0 + $0x8] sm:$0xff]   ;;  %v1253_v7 = vld [vmem:[%s1499_s4 + $0x18] sm:$0xff]  }
   0x3   :  { %933 = vmatprep.subr.bf16.mxu1 %v1173_v0  ;;  %921 = vmatprep.subr.bf16.mxu0 %v1102_v4  ;;  %v1104_v5 = vld [vmem:[%s1501_s0] sm:$0xff]   ;;  %v1273_v9 = vld [vmem:[%s1499_s4 + $0x28] sm:$0xff]   ;;  %v1282_v10 = vld [vmem:[%s1499_s4 + $0x30] sm:$0xff]  }
   0x4   :  { %922 = vmatpush3.bf16.msra.mxu0 %v1102_v4  ;;  %923 = vmatprep.mubr.msk.bf16.mxu0 %vm68_vm1, %v1104_v5  ;;  %v1264_v8 = vld [vmem:[%s1499_s4 + $0x20] sm:$0xff]   ;;  %v1291_v11 = vld [vmem:[%s1499_s4 + $0x38] sm:$0xff]   ;;  %v1107_v26 = vld [vmem:[%s1501_s0 + $0x10] sm:$0xff]  }
   0x5   :  { %951 = vmatprep.subr.bf16.mxu0 %v1173_v0  ;;  %v28_v12 = vld [vmem:[%s1502_s1] sm:$0xff]  ;;  %v1108_v27 = vld [vmem:[%s1501_s0 + $0x18] sm:$0xff]  }
   0x6   :  { %934 = vmatpush3.bf16.msra.mxu1 %v1230_v2  ;;  %v173_v13 = vpack.c.bf16 %v28_v12, %v28_v12  ;;  %v30_v31 = vld [vmem:[%s1503_s2] sm:$0xff] }
   0x7   :  { %935 = vmatprep.subr.bf16.mxu1 %v1173_v0  ;;  %924 = vmatmul.mubr.msk.bf16.vlgmr.msra.gmra.mrb[0].mxu0 %vm68_vm1, %v1105_v6 }
   0x8   :  { %952 = vmatpush3.bf16.msra.mxu0 %v1222_v1  ;;  %927 = vmatprep.mubr.msk.bf16.mxu0 %vm68_vm1, %v1107_v26 }
   0x9   :  { %953 = vmatprep.subr.bf16.mxu0 %v1173_v0 }
   0xa   :  { %936 = vmatpush3.bf16.msra.mxu1 %v1236_v3 }
   0xb   :  { %937 = vmatprep.subr.bf16.mxu1 %v1173_v0 }
   0xc   :  { %954 = vmatpush3.bf16.msra.mxu0 %v1230_v2 }
   0xd   :  { %955 = vmatprep.subr.bf16.mxu0 %v1173_v0 }
   0xe   :  { %938 = vmatpush3.bf16.msra.mxu1 %v1253_v7 }
   0xf   :  { %939 = vmatprep.subr.bf16.mxu1 %v1173_v0  ;;  %928 = vmatmul.mubr.msk.bf16.gmra.mrb[4].mxu0 %vm68_vm1, %v1108_v27 }
  0x10   :  { %956 = vmatpush3.bf16.msra.mxu0 %v1236_v3  ;;  %967 = vmatprep.mubr.msk.bf16.mxu0 %vm1174_vm0, %v1173_v0 }
  0x11   :  { %957 = vmatprep.subr.bf16.mxu0 %v1173_v0 }
  0x12   :  { %940 = vmatpush3.bf16.msra.mxu1 %v1264_v8 }
  0x13   :  { %941 = vmatprep.subr.bf16.mxu1 %v1173_v0 }
  0x14   :  { %958 = vmatpush3.bf16.msra.mxu0 %v1253_v7 }
  0x15   :  { %959 = vmatprep.subr.bf16.mxu0 %v1173_v0 }
  0x16   :  { %942 = vmatpush3.bf16.msra.mxu1 %v1273_v9 }
  0x17   :  { %943 = vmatprep.subr.bf16.mxu1 %v1173_v0 }
  0x18   :  { %960 = vmatpush3.bf16.msra.mxu0 %v1264_v8 }
  0x19   :  { %961 = vmatprep.subr.bf16.mxu0 %v1173_v0 }
  0x1a   :  { %944 = vmatpush3.bf16.msra.mxu1 %v1282_v10 }
  0x1b   :  { %945 = vmatprep.subr.bf16.mxu1 %v1173_v0 }
  0x1c   :  { %962 = vmatpush3.bf16.msra.mxu0 %v1273_v9 }
  0x1d   :  { %963 = vmatprep.subr.bf16.mxu0 %v1173_v0 }
  0x1e   :  { %946 = vmatpush3.bf16.msra.mxu1 %v1291_v11 }
  0x1f   :  { %971 = vmatprep.subr.bf16.mxu1 %v1173_v0 }
  0x20   :  { %964 = vmatpush3.bf16.msra.mxu0 %v1282_v10 }
  0x21   :  { %948 = vmatmul.mubr.bf16.vlgmr.msra.gmra.mrb[0].mxu1 %v173_v13  ;;  %965 = vmatprep.subr.bf16.mxu0 %v1173_v0 }
  0x22   :  { %972 = vmatpush3.bf16.msra.mxu1 %v1222_v1  ;;  %987 = vmatprep.mubr.msk.bf16.mxu1 %vm1174_vm0, %v1173_v0 }
  0x23   :  { %973 = vmatprep.subr.bf16.mxu1 %v1173_v0 }
  0x24   :  { %966 = vmatpush3.bf16.msra.mxu0 %v1291_v11 }
  0x25   :  { %991 = vmatprep.subr.bf16.mxu0 %v1173_v0 }
  0x26   :  { %974 = vmatpush3.bf16.msra.mxu1 %v1230_v2 }
  0x27   :  { %975 = vmatprep.subr.bf16.mxu1 %v1173_v0 }
  0x2a   :  { %976 = vmatpush3.bf16.msra.mxu1 %v1236_v3 }
  0x2b   :  { %977 = vmatprep.subr.bf16.mxu1 %v1173_v0 }
  0x2e   :  { %978 = vmatpush3.bf16.msra.mxu1 %v1253_v7 }
  0x2f   :  { %979 = vmatprep.subr.bf16.mxu1 %v1173_v0 }
  0x32   :  { %980 = vmatpush3.bf16.msra.mxu1 %v1264_v8 }
  0x33   :  { %981 = vmatprep.subr.bf16.mxu1 %v1173_v0 }
  0x36   :  { %982 = vmatpush3.bf16.msra.mxu1 %v1273_v9 }
  0x37   :  { %983 = vmatprep.subr.bf16.mxu1 %v1173_v0 }
  0x3a   :  { %984 = vmatpush3.bf16.msra.mxu1 %v1282_v10 }
  0x3b   :  { %985 = vmatprep.subr.bf16.mxu1 %v1173_v0 }
  0x3e   :  { %986 = vmatpush3.bf16.msra.mxu1 %v1291_v11 }
  0x3f   :  { %1011 = vmatprep.subr.bf16.mxu1 %v1173_v0 }
  0xda   :  { %v1326_v14 = vpop.f32.mrb[0].mxu0 }
  0xdb   :  { %v115_v15 = vpop.f32.mrb[1].mxu0 }
  0xdc   :  { %v1328_v16 = vpop.f32.mrb[2].mxu0 }
  0xdd   :  { %v118_v17 = vpop.f32.mrb[3].mxu0 }
  0xe2   :  { %v1367_v40 = vpop.f32.mrb[4].mxu0 }
  0xe3   :  { %v1369_v41 = vpop.f32.mrb[5].mxu0 }
  0xe4   :  { %v1371_v42 = vpop.f32.mrb[6].mxu0 }
  0xe5   :  { %v1373_v43 = vpop.f32.mrb[7].mxu0 }
  0xf4   :  { %v256_v18 = vpop.f32.mrb[0].mxu1 }
  0xf5   :  { %v262_v19 = vadd.f32 %v256_v18, %v115_v15  ;;  %v949_v20 = vpop.f32.mrb[1].mxu1 }
  0xf6   :  { %v259_v21 = vpop.f32.mrb[2].mxu1 }
  0xf7   :  { %v829_v22 = vmul.f32 -1.442695, %v262_v19  ;;  %v950_v23 = vpop.f32.mrb[3].mxu1 }
  0xf9   :  { %1109 = vpow2.f32 %v829_v22 }
 0x103   :  { %v1110_v24 = vpop.eup %1109 }
 0x104   :  { %v266_v25 = vadd.f32 1.0, %v1110_v24 }
 0x106   :  { %1111 = vrcp.f32 %v266_v25 }
 0x107   :  { %1113 = vtanh.f32 %v262_v19 }
 0x110   :  { %v1112_v28 = vpop.eup %1111 }
 0x111   :  { %278 = vrot.lane.b32.xlu1 %v1112_v28, %s1175_s26  ;;  %271 = vrot.lane.b32.xlu0 %v1112_v28, %s1176_s27  ;;  %v1114_v29 = vpop.eup %1113 }
 0x115   :  { %275 = vrot.lane.b32.xlu0 %v1114_v29, %s1177_s28 }
 0x183   :  { %v272_v30 = vpop.permute.xlu0 %271  ;;  %v279_v37 = vpop.permute.xlu1 %278 }
 0x184   :  { %v281_v33 = vmul.f32 %v272_v30, %v30_v31 }
 0x187   :  { %v276_v32 = vpop.permute.xlu0 %275 }
 0x188   :  { %v282_v34 = vmul.f32 %v1112_v28, %v276_v32 }
 0x18a   :  { %v283_v35 = vadd.f32 %v282_v34, %v281_v33 }
 0x18c   :  { %1115 = vtanh.f32 %v283_v35 }
 0x196   :  { %v1116_v36 = vpop.eup %1115 }
 0x197   :  { %v285_v38 = vmul.f32 %v1116_v36, %v279_v37 }
 0x199   :  { %288 = vst [vmem:[%s1504_s5] sm:$0xff] %v285_v38  ;;  %v292_v39 = vpack.c.bf16 %v285_v38, %v285_v38 }
 0x19b   :  { %968 = vmatmul.mubr.bf16.vlgmr.msra.gmra.mrb[8].mxu0 %v292_v39 }
 0x19c   :  { %992 = vmatpush3.bf16.msra.mxu0 %v1222_v1  ;;  %1007 = vmatprep.mubr.msk.bf16.mxu0 %vm1174_vm0, %v1173_v0 }
 0x19d   :  { %993 = vmatprep.subr.bf16.mxu0 %v1173_v0 }
 0x1a0   :  { %994 = vmatpush3.bf16.msra.mxu0 %v1230_v2 }
 0x1a1   :  { %995 = vmatprep.subr.bf16.mxu0 %v1173_v0 }
 0x1a4   :  { %996 = vmatpush3.bf16.msra.mxu0 %v1236_v3 }
 0x1a5   :  { %997 = vmatprep.subr.bf16.mxu0 %v1173_v0 }
 0x1a8   :  { %998 = vmatpush3.bf16.msra.mxu0 %v1253_v7 }
 0x1a9   :  { %999 = vmatprep.subr.bf16.mxu0 %v1173_v0 }
 0x1ac   :  { %1000 = vmatpush3.bf16.msra.mxu0 %v1264_v8 }
 0x1ad   :  { %1001 = vmatprep.subr.bf16.mxu0 %v1173_v0 }
 0x1b0   :  { %1002 = vmatpush3.bf16.msra.mxu0 %v1273_v9 }
 0x1b1   :  { %1003 = vmatprep.subr.bf16.mxu0 %v1173_v0 }
 0x1b4   :  { %1004 = vmatpush3.bf16.msra.mxu0 %v1282_v10 }
 0x1b5   :  { %1005 = vmatprep.subr.bf16.mxu0 %v1173_v0 }
 0x1b8   :  { %1006 = vmatpush3.bf16.msra.mxu0 %v1291_v11 }
 0x1b9   :  { %1031 = vmatprep.subr.bf16.mxu0 %v1173_v0 }
 0x26e   :  { %v327_v44 = vpop.f32.mrb[8].mxu0 }
 0x26f   :  { %v333_v45 = vadd.f32 %v327_v44, %v118_v17  ;;  %v969_v46 = vpop.f32.mrb[9].mxu0 }
 0x270   :  { %v330_v47 = vpop.f32.mrb[10].mxu0 }
 0x271   :  { %v830_v48 = vmul.f32 -1.442695, %v333_v45  ;;  %1117 = vtanh.f32 %v333_v45  ;;  %v970_v49 = vpop.f32.mrb[11].mxu0 }
 0x273   :  { %1119 = vpow2.f32 %v830_v48 }
 0x27b   :  { %v1118_v50 = vpop.eup %1117 }
 0x27c   :  { %346 = vrot.lane.b32.xlu0 %v1118_v50, %s1177_s28 }
 0x27d   :  { %v1120_v51 = vpop.eup %1119 }
 0x27e   :  { %v337_v52 = vadd.f32 1.0, %v1120_v51 }
 0x280   :  { %1121 = vrcp.f32 %v337_v52 }
 0x28a   :  { %v1122_v53 = vpop.eup %1121 }
 0x28b   :  { %342 = vrot.lane.b32.xlu1 %v1122_v53, %s1176_s27 }
 0x28f   :  { %349 = vrot.lane.b32.xlu1 %v1122_v53, %s1175_s26 }
 0x2ee   :  { %v347_v54 = vpop.permute.xlu0 %346 }
 0x2ef   :  { %v353_v56 = vmul.f32 %v1122_v53, %v347_v54 }
 0x2fd   :  { %v343_v55 = vpop.permute.xlu1 %342 }
 0x2fe   :  { %v352_v57 = vmul.f32 %v343_v55, %v283_v35 }
 0x300   :  { %v354_v58 = vadd.f32 %v353_v56, %v352_v57 }
 0x301   :  { %v350_v60 = vpop.permute.xlu1 %349 }
 0x302   :  { %1123 = vtanh.f32 %v354_v58 }
 0x30c   :  { %v1124_v59 = vpop.eup %1123 }
 0x30d   :  { %v356_v61 = vmul.f32 %v1124_v59, %v350_v60 }
 0x30f   :  { %831 = vst [vmem:[%s1504_s5 + $0x8] sm:$0xff] %v356_v61  ;;  %v364_v62 = vpack.c.bf16 %v356_v61, %v356_v61 }
 0x311   :  { %988 = vmatmul.mubr.bf16.vlgmr.msra.gmra.mrb[4].mxu1 %v364_v62 }
 0x312   :  { %1012 = vmatpush3.bf16.msra.mxu1 %v1222_v1  ;;  %1027 = vmatprep.mubr.msk.bf16.mxu1 %vm1174_vm0, %v1173_v0 }
 0x313   :  { %1013 = vmatprep.subr.bf16.mxu1 %v1173_v0 }
 0x316   :  { %1014 = vmatpush3.bf16.msra.mxu1 %v1230_v2 }
 0x317   :  { %1015 = vmatprep.subr.bf16.mxu1 %v1173_v0 }
 0x31a   :  { %1016 = vmatpush3.bf16.msra.mxu1 %v1236_v3 }
 0x31b   :  { %1017 = vmatprep.subr.bf16.mxu1 %v1173_v0 }
 0x31e   :  { %1018 = vmatpush3.bf16.msra.mxu1 %v1253_v7 }
 0x31f   :  { %1019 = vmatprep.subr.bf16.mxu1 %v1173_v0 }
 0x322   :  { %1020 = vmatpush3.bf16.msra.mxu1 %v1264_v8 }
 0x323   :  { %1021 = vmatprep.subr.bf16.mxu1 %v1173_v0 }
 0x326   :  { %1022 = vmatpush3.bf16.msra.mxu1 %v1273_v9 }
 0x327   :  { %1023 = vmatprep.subr.bf16.mxu1 %v1173_v0 }
 0x32a   :  { %1024 = vmatpush3.bf16.msra.mxu1 %v1282_v10 }
 0x32b   :  { %1025 = vmatprep.subr.bf16.mxu1 %v1173_v0 }
 0x32e   :  { %1026 = vmatpush3.bf16.msra.mxu1 %v1291_v11 }
 0x32f   :  { %1051 = vmatprep.subr.bf16.mxu1 %v1173_v0 }
 0x3e4   :  { %v399_v63 = vpop.f32.mrb[4].mxu1 }
 0x3e5   :  { %v405_v4 = vadd.f32 %v1326_v14, %v399_v63  ;;  %v989_v5 = vpop.f32.mrb[5].mxu1 }
 0x3e6   :  { %v402_v6 = vpop.f32.mrb[6].mxu1 }
 0x3e7   :  { %v832_v12 = vmul.f32 -1.442695, %v405_v4  ;;  %1125 = vtanh.f32 %v405_v4  ;;  %v990_v13 = vpop.f32.mrb[7].mxu1 }
 0x3e9   :  { %1127 = vpow2.f32 %v832_v12 }
 0x3f1   :  { %v1126_v15 = vpop.eup %1125 }
 0x3f2   :  { %418 = vrot.lane.b32.xlu1 %v1126_v15, %s1177_s28 }
 0x3f3   :  { %v1128_v17 = vpop.eup %1127 }
 0x3f4   :  { %v409_v18 = vadd.f32 1.0, %v1128_v17 }
 0x3f6   :  { %1129 = vrcp.f32 %v409_v18 }
 0x400   :  { %v1130_v19 = vpop.eup %1129 }
 0x401   :  { %414 = vrot.lane.b32.xlu0 %v1130_v19, %s1176_s27 }
 0x405   :  { %421 = vrot.lane.b32.xlu0 %v1130_v19, %s1175_s26 }
 0x464   :  { %v419_v20 = vpop.permute.xlu1 %418 }
 0x465   :  { %v425_v14 = vmul.f32 %v1130_v19, %v419_v20 }
 0x473   :  { %v415_v21 = vpop.permute.xlu0 %414 }
 0x474   :  { %v424_v22 = vmul.f32 %v415_v21, %v354_v58 }
 0x476   :  { %v426_v23 = vadd.f32 %v425_v14, %v424_v22 }
 0x477   :  { %v422_v25 = vpop.permute.xlu0 %421 }
 0x478   :  { %1131 = vtanh.f32 %v426_v23 }
 0x482   :  { %v1132_v24 = vpop.eup %1131 }
 0x483   :  { %v428_v26 = vmul.f32 %v1132_v24, %v422_v25 }
 0x485   :  { %833 = vst [vmem:[%s1504_s5 + $0x10] sm:$0xff] %v428_v26  ;;  %v436_v27 = vpack.c.bf16 %v428_v26, %v428_v26 }
 0x487   :  { %1008 = vmatmul.mubr.bf16.vlgmr.msra.gmra.mrb[12].mxu0 %v436_v27 }
 0x488   :  { %1032 = vmatpush3.bf16.msra.mxu0 %v1222_v1  ;;  %1047 = vmatprep.mubr.msk.bf16.mxu0 %vm1174_vm0, %v1173_v0 }
 0x489   :  { %1033 = vmatprep.subr.bf16.mxu0 %v1173_v0 }
 0x48c   :  { %1034 = vmatpush3.bf16.msra.mxu0 %v1230_v2 }
 0x48d   :  { %1035 = vmatprep.subr.bf16.mxu0 %v1173_v0 }
 0x490   :  { %1036 = vmatpush3.bf16.msra.mxu0 %v1236_v3 }
 0x491   :  { %1037 = vmatprep.subr.bf16.mxu0 %v1173_v0 }
 0x494   :  { %1038 = vmatpush3.bf16.msra.mxu0 %v1253_v7 }
 0x495   :  { %1039 = vmatprep.subr.bf16.mxu0 %v1173_v0 }
 0x498   :  { %1040 = vmatpush3.bf16.msra.mxu0 %v1264_v8 }
 0x499   :  { %1041 = vmatprep.subr.bf16.mxu0 %v1173_v0 }
 0x49c   :  { %1042 = vmatpush3.bf16.msra.mxu0 %v1273_v9 }
 0x49d   :  { %1043 = vmatprep.subr.bf16.mxu0 %v1173_v0 }
 0x4a0   :  { %1044 = vmatpush3.bf16.msra.mxu0 %v1282_v10 }
 0x4a1   :  { %1045 = vmatprep.subr.bf16.mxu0 %v1173_v0 }
 0x4a4   :  { %1046 = vmatpush3.bf16.msra.mxu0 %v1291_v11 }
 0x4a5   :  { %1071 = vmatprep.subr.bf16.mxu0 %v1173_v0 }
 0x55a   :  { %v471_v28 = vpop.f32.mrb[12].mxu0 }
 0x55b   :  { %v477_v29 = vadd.f32 %v1328_v16, %v471_v28  ;;  %v1009_v30 = vpop.f32.mrb[13].mxu0 }
 0x55c   :  { %v474_v31 = vpop.f32.mrb[14].mxu0 }
 0x55d   :  { %v834_v32 = vmul.f32 -1.442695, %v477_v29  ;;  %1133 = vtanh.f32 %v477_v29  ;;  %v1010_v33 = vpop.f32.mrb[15].mxu0 }
 0x55f   :  { %1135 = vpow2.f32 %v834_v32 }
 0x567   :  { %v1134_v34 = vpop.eup %1133 }
 0x568   :  { %490 = vrot.lane.b32.xlu0 %v1134_v34, %s1177_s28 }
 0x569   :  { %v1136_v35 = vpop.eup %1135 }
 0x56a   :  { %v481_v36 = vadd.f32 1.0, %v1136_v35 }
 0x56c   :  { %1137 = vrcp.f32 %v481_v36 }
 0x576   :  { %v1138_v37 = vpop.eup %1137 }
 0x577   :  { %486 = vrot.lane.b32.xlu1 %v1138_v37, %s1176_s27 }
 0x57b   :  { %493 = vrot.lane.b32.xlu1 %v1138_v37, %s1175_s26 }
 0x5da   :  { %v491_v38 = vpop.permute.xlu0 %490 }
 0x5db   :  { %v497_v16 = vmul.f32 %v1138_v37, %v491_v38 }
 0x5e9   :  { %v487_v39 = vpop.permute.xlu1 %486 }
 0x5ea   :  { %v496_v44 = vmul.f32 %v487_v39, %v426_v23 }
 0x5ec   :  { %v498_v45 = vadd.f32 %v497_v16, %v496_v44 }
 0x5ed   :  { %v494_v47 = vpop.permute.xlu1 %493 }
 0x5ee   :  { %1139 = vtanh.f32 %v498_v45 }
 0x5f8   :  { %v1140_v46 = vpop.eup %1139 }
 0x5f9   :  { %v500_v48 = vmul.f32 %v1140_v46, %v494_v47 }
 0x5fb   :  { %835 = vst [vmem:[%s1504_s5 + $0x18] sm:$0xff] %v500_v48  ;;  %v508_v49 = vpack.c.bf16 %v500_v48, %v500_v48 }
 0x5fd   :  { %1028 = vmatmul.mubr.bf16.vlgmr.msra.gmra.mrb[8].mxu1 %v508_v49 }
 0x5fe   :  { %1052 = vmatpush3.bf16.msra.mxu1 %v1222_v1  ;;  %1067 = vmatprep.mubr.msk.bf16.mxu1 %vm1174_vm0, %v1173_v0 }
 0x5ff   :  { %1053 = vmatprep.subr.bf16.mxu1 %v1173_v0 }
 0x602   :  { %1054 = vmatpush3.bf16.msra.mxu1 %v1230_v2 }
 0x603   :  { %1055 = vmatprep.subr.bf16.mxu1 %v1173_v0 }
 0x606   :  { %1056 = vmatpush3.bf16.msra.mxu1 %v1236_v3 }
 0x607   :  { %1057 = vmatprep.subr.bf16.mxu1 %v1173_v0 }
 0x60a   :  { %1058 = vmatpush3.bf16.msra.mxu1 %v1253_v7 }
 0x60b   :  { %1059 = vmatprep.subr.bf16.mxu1 %v1173_v0 }
 0x60e   :  { %1060 = vmatpush3.bf16.msra.mxu1 %v1264_v8 }
 0x60f   :  { %1061 = vmatprep.subr.bf16.mxu1 %v1173_v0 }
 0x612   :  { %1062 = vmatpush3.bf16.msra.mxu1 %v1273_v9 }
 0x613   :  { %1063 = vmatprep.subr.bf16.mxu1 %v1173_v0 }
 0x616   :  { %1064 = vmatpush3.bf16.msra.mxu1 %v1282_v10 }
 0x617   :  { %1065 = vmatprep.subr.bf16.mxu1 %v1173_v0 }
 0x61a   :  { %1066 = vmatpush3.bf16.msra.mxu1 %v1291_v11 }
 0x6d0   :  { %v543_v50 = vpop.f32.mrb[8].mxu1 }
 0x6d1   :  { %v549_v51 = vadd.f32 %v543_v50, %v1369_v41  ;;  %v1029_v52 = vpop.f32.mrb[9].mxu1 }
 0x6d2   :  { %v546_v53 = vpop.f32.mrb[10].mxu1 }
 0x6d3   :  { %v836_v54 = vmul.f32 -1.442695, %v549_v51  ;;  %1141 = vtanh.f32 %v549_v51  ;;  %v1030_v55 = vpop.f32.mrb[11].mxu1 }
 0x6d5   :  { %1143 = vpow2.f32 %v836_v54 }
 0x6dd   :  { %v1142_v56 = vpop.eup %1141 }
 0x6de   :  { %562 = vrot.lane.b32.xlu1 %v1142_v56, %s1177_s28 }
 0x6df   :  { %v1144_v57 = vpop.eup %1143 }
 0x6e0   :  { %v553_v58 = vadd.f32 1.0, %v1144_v57 }
 0x6e2   :  { %1145 = vrcp.f32 %v553_v58 }
 0x6ec   :  { %v1146_v59 = vpop.eup %1145 }
 0x6ed   :  { %558 = vrot.lane.b32.xlu0 %v1146_v59, %s1176_s27 }
 0x6f1   :  { %565 = vrot.lane.b32.xlu0 %v1146_v59, %s1175_s26 }
 0x750   :  { %v563_v60 = vpop.permute.xlu1 %562 }
 0x751   :  { %v569_v41 = vmul.f32 %v1146_v59, %v563_v60 }
 0x75f   :  { %v559_v61 = vpop.permute.xlu0 %558 }
 0x760   :  { %v568_v62 = vmul.f32 %v559_v61, %v498_v45 }
 0x762   :  { %v570_v63 = vadd.f32 %v569_v41, %v568_v62 }
 0x763   :  { %v566_v5 = vpop.permute.xlu0 %565 }
 0x764   :  { %1147 = vtanh.f32 %v570_v63 }
 0x76e   :  { %v1148_v4 = vpop.eup %1147 }
 0x76f   :  { %v572_v6 = vmul.f32 %v1148_v4, %v566_v5 }
 0x771   :  { %837 = vst [vmem:[%s1504_s5 + $0x20] sm:$0xff] %v572_v6  ;;  %v580_v12 = vpack.c.bf16 %v572_v6, %v572_v6 }
 0x773   :  { %1048 = vmatmul.mubr.bf16.vlgmr.msra.gmra.mrb[16].mxu0 %v580_v12 }
 0x774   :  { %1072 = vmatpush3.bf16.msra.mxu0 %v1222_v1  ;;  %1087 = vmatprep.mubr.msk.bf16.mxu0 %vm1174_vm0, %v1173_v0 }
 0x775   :  { %1073 = vmatprep.subr.bf16.mxu0 %v1173_v0 }
 0x778   :  { %1074 = vmatpush3.bf16.msra.mxu0 %v1230_v2 }
 0x779   :  { %1075 = vmatprep.subr.bf16.mxu0 %v1173_v0 }
 0x77c   :  { %1076 = vmatpush3.bf16.msra.mxu0 %v1236_v3 }
 0x77d   :  { %1077 = vmatprep.subr.bf16.mxu0 %v1173_v0 }
 0x780   :  { %1078 = vmatpush3.bf16.msra.mxu0 %v1253_v7 }
 0x781   :  { %1079 = vmatprep.subr.bf16.mxu0 %v1173_v0 }
 0x784   :  { %1080 = vmatpush3.bf16.msra.mxu0 %v1264_v8 }
 0x785   :  { %1081 = vmatprep.subr.bf16.mxu0 %v1173_v0 }
 0x788   :  { %1082 = vmatpush3.bf16.msra.mxu0 %v1273_v9 }
 0x789   :  { %1083 = vmatprep.subr.bf16.mxu0 %v1173_v0 }
 0x78c   :  { %1084 = vmatpush3.bf16.msra.mxu0 %v1282_v10 }
 0x78d   :  { %1085 = vmatprep.subr.bf16.mxu0 %v1173_v0 }
 0x790   :  { %1086 = vmatpush3.bf16.msra.mxu0 %v1291_v11 }
 0x846   :  { %v615_v1 = vpop.f32.mrb[16].mxu0 }
 0x847   :  { %v621_v2 = vadd.f32 %v615_v1, %v1373_v43  ;;  %v1049_v3 = vpop.f32.mrb[17].mxu0 }
 0x848   :  { %v618_v7 = vpop.f32.mrb[18].mxu0 }
 0x849   :  { %v838_v13 = vmul.f32 -1.442695, %v621_v2  ;;  %1149 = vtanh.f32 %v621_v2  ;;  %v1050_v8 = vpop.f32.mrb[19].mxu0 }
 0x84b   :  { %1151 = vpow2.f32 %v838_v13 }
 0x853   :  { %v1150_v15 = vpop.eup %1149 }
 0x854   :  { %634 = vrot.lane.b32.xlu0 %v1150_v15, %s1177_s28 }
 0x855   :  { %v1152_v9 = vpop.eup %1151 }
 0x856   :  { %v625_v17 = vadd.f32 1.0, %v1152_v9 }
 0x858   :  { %1153 = vrcp.f32 %v625_v17 }
 0x862   :  { %v1154_v10 = vpop.eup %1153 }
 0x863   :  { %630 = vrot.lane.b32.xlu1 %v1154_v10, %s1176_s27 }
 0x867   :  { %637 = vrot.lane.b32.xlu1 %v1154_v10, %s1175_s26 }
 0x8c6   :  { %v635_v0 = vpop.permute.xlu0 %634 }
 0x8c7   :  { %v641_v43 = vmul.f32 %v1154_v10, %v635_v0 }
 0x8d5   :  { %v631_v11 = vpop.permute.xlu1 %630 }
 0x8d6   :  { %v640_v18 = vmul.f32 %v631_v11, %v570_v63 }
 0x8d8   :  { %v642_v19 = vadd.f32 %v641_v43, %v640_v18 }
 0x8d9   :  { %v638_v21 = vpop.permute.xlu1 %637 }
 0x8da   :  { %1155 = vtanh.f32 %v642_v19 }
 0x8e4   :  { %v1156_v20 = vpop.eup %1155 }
 0x8e5   :  { %v644_v14 = vmul.f32 %v1156_v20, %v638_v21 }
 0x8e7   :  { %839 = vst [vmem:[%s1504_s5 + $0x28] sm:$0xff] %v644_v14  ;;  %v652_v22 = vpack.c.bf16 %v644_v14, %v644_v14 }
 0x8e9   :  { %1068 = vmatmul.mubr.bf16.vlgmr.msra.gmra.mrb[12].mxu1 %v652_v22 }
 0x9bc   :  { %v687_v23 = vpop.f32.mrb[12].mxu1 }
 0x9bd   :  { %v693_v24 = vadd.f32 %v1367_v40, %v687_v23  ;;  %v1069_v25 = vpop.f32.mrb[13].mxu1 }
 0x9be   :  { %v690_v26 = vpop.f32.mrb[14].mxu1 }
 0x9bf   :  { %v840_v27 = vmul.f32 -1.442695, %v693_v24  ;;  %1157 = vtanh.f32 %v693_v24  ;;  %v1070_v28 = vpop.f32.mrb[15].mxu1 }
 0x9c1   :  { %1159 = vpow2.f32 %v840_v27 }
 0x9c9   :  { %v1158_v29 = vpop.eup %1157 }
 0x9ca   :  { %706 = vrot.lane.b32.xlu1 %v1158_v29, %s1177_s28 }
 0x9cb   :  { %v1160_v30 = vpop.eup %1159 }
 0x9cc   :  { %v697_v31 = vadd.f32 1.0, %v1160_v30 }
 0x9ce   :  { %1161 = vrcp.f32 %v697_v31 }
 0x9d8   :  { %v1162_v32 = vpop.eup %1161 }
 0x9d9   :  { %702 = vrot.lane.b32.xlu0 %v1162_v32, %s1176_s27 }
 0x9dd   :  { %709 = vrot.lane.b32.xlu0 %v1162_v32, %s1175_s26 }
 0xa3c   :  { %v707_v33 = vpop.permute.xlu1 %706 }
 0xa3d   :  { %v713_v40 = vmul.f32 %v1162_v32, %v707_v33 }
 0xa4b   :  { %v703_v34 = vpop.permute.xlu0 %702 }
 0xa4c   :  { %v712_v35 = vmul.f32 %v703_v34, %v642_v19 }
 0xa4e   :  { %v714_v36 = vadd.f32 %v713_v40, %v712_v35 }
 0xa4f   :  { %v710_v38 = vpop.permute.xlu0 %709 }
 0xa50   :  { %1163 = vtanh.f32 %v714_v36 }
 0xa5a   :  { %v1164_v37 = vpop.eup %1163 }
 0xa5b   :  { %v716_v39 = vmul.f32 %v1164_v37, %v710_v38 }
 0xa5d   :  { %841 = vst [vmem:[%s1504_s5 + $0x30] sm:$0xff] %v716_v39  ;;  %v724_v16 = vpack.c.bf16 %v716_v39, %v716_v39 }
 0xa5f   :  { %1088 = vmatmul.mubr.bf16.vlgmr.msra.gmra.mrb[20].mxu0 %v724_v16 }
 0xb32   :  { %v759_v44 = vpop.f32.mrb[20].mxu0 }
 0xb33   :  { %v765_v45 = vadd.f32 %v1371_v42, %v759_v44  ;;  %v1089_v46 = vpop.f32.mrb[21].mxu0 }
 0xb34   :  { %v762_v47 = vpop.f32.mrb[22].mxu0 }
 0xb35   :  { %v842_v48 = vmul.f32 -1.442695, %v765_v45  ;;  %1165 = vtanh.f32 %v765_v45  ;;  %v1090_v49 = vpop.f32.mrb[23].mxu0 }
 0xb37   :  { %1167 = vpow2.f32 %v842_v48 }
 0xb3f   :  { %v1166_v50 = vpop.eup %1165 }
 0xb40   :  { %778 = vrot.lane.b32.xlu0 %v1166_v50, %s1177_s28 }
 0xb41   :  { %v1168_v51 = vpop.eup %1167 }
 0xb42   :  { %v769_v52 = vadd.f32 1.0, %v1168_v51 }
 0xb44   :  { %1169 = vrcp.f32 %v769_v52 }
 0xb4e   :  { %v1170_v53 = vpop.eup %1169 }
 0xb4f   :  { %774 = vrot.lane.b32.xlu1 %v1170_v53, %s1176_s27 }
 0xb53   :  { %781 = vrot.lane.b32.xlu1 %v1170_v53, %s1175_s26 }
 0xbb2   :  { %v779_v54 = vpop.permute.xlu0 %778 }
 0xbb3   :  { %v785_v42 = vmul.f32 %v1170_v53, %v779_v54 }
 0xbc1   :  { %v775_v55 = vpop.permute.xlu1 %774 }
 0xbc2   :  { %v784_v56 = vmul.f32 %v775_v55, %v714_v36 }
 0xbc4   :  { %v786_v57 = vadd.f32 %v785_v42, %v784_v56 }
 0xbc5   :  { %v782_v59 = vpop.permute.xlu1 %781 }
 0xbc6   :  { %1171 = vtanh.f32 %v786_v57  ;;  %799 = vst [vmem:[%s1505_s7] sm:$0xff] %v786_v57 }
 0xbd0   :  { %v1172_v58 = vpop.eup %1171 }
 0xbd1   :  { %v788_v60 = vmul.f32 %v1172_v58, %v782_v59 }
 0xbd3   :  { %843 = vst [vmem:[%s1504_s5 + $0x38] sm:$0xff] %v788_v60  ;;  %797 = vst [vmem:[%s1506_s6] sm:$0xff] %v788_v60 }

</bundles_post_ra>
